<compile_context>
chip_gen: v7x
topology: tpu7x:2x2x1
jax: 0.10.0
libtpu: 0.0.40
codegen_flags: <defaults>
</compile_context>

<pallas_src>
import functools

import jax
import jax.numpy as jnp
from jax.experimental import pallas as pl
from jax.experimental.pallas import tpu as pltpu


# ----------------------------------------------------------------------------
# Fused Pallas kernel: one invocation covers the whole forward pass.
# ----------------------------------------------------------------------------
def _imiracle_fused_kernel(
    x_ref,                                     # [N, din]
    bw1_ref, bb1_ref, bw2_ref, bb2_ref,        # basic MLP (l2 padded to dout_pad)
    adj_ref,                                   # [T, N, N]  bf16
    dinv_ref,                                  # [T, N, 1]  f32 (precomputed)
    gw1_ref, gb1_ref, gw2_ref, gb2_ref,        # GCN layer 1 & 2 (stacked on T)
    dw1_ref, db1_ref, dw2_ref, db2_ref,        # decoder MLP (l2 GRN-folded+padded)
    o_ref,                                     # [N, dout_pad] lane-dense output
    *, num_terms,
):
    x = x_ref[...]

    # --- basic MLP initializes the accumulator --------------------------------
    h = jnp.dot(x, bw1_ref[...], preferred_element_type=jnp.float32)
    h = jnp.maximum(h + bb1_ref[...], 0.0)
    acc = jnp.dot(h, bw2_ref[...], preferred_element_type=jnp.float32)
    acc = jnp.maximum(acc + bb2_ref[...], 0.0)

    # --- unrolled loop over interaction terms (independent chains interleave) -
    for t in range(num_terms):
        adj = adj_ref[t]                       # [N, N] bf16 (exact 0/1 values)
        dinv = dinv_ref[t]                     # [N, 1] f32

        # GCN layer 1:  relu( dinv * (adj @ (dinv * x)) @ W1 + b1 )
        # adj contraction runs bf16 x bf16 on the MXU with f32 accumulation.
        xs = (dinv * x).astype(jnp.bfloat16)
        m1 = jnp.dot(adj, xs, preferred_element_type=jnp.float32)
        h1 = jnp.dot(dinv * m1, gw1_ref[t], preferred_element_type=jnp.float32)
        h1 = jnp.maximum(h1 + gb1_ref[t], 0.0)

        # GCN layer 2
        hs = (dinv * h1).astype(jnp.bfloat16)
        m2 = jnp.dot(adj, hs, preferred_element_type=jnp.float32)
        h2 = jnp.dot(dinv * m2, gw2_ref[t], preferred_element_type=jnp.float32)
        h2 = jnp.maximum(h2 + gb2_ref[t], 0.0)

        # decoder MLP (GRN mask already folded into dw2/db2; mask >= 0)
        d1 = jnp.dot(h2, dw1_ref[t], preferred_element_type=jnp.float32)
        d1 = jnp.maximum(d1 + db1_ref[t], 0.0)
        x_lr = jnp.dot(d1, dw2_ref[t], preferred_element_type=jnp.float32)
        x_lr = jnp.maximum(x_lr + db2_ref[t], 0.0)

        acc = acc + x_lr

    o_ref[...] = acc


# ----------------------------------------------------------------------------
# Parameter construction & glue
# ----------------------------------------------------------------------------
def init_linear(key, din, dout, scale=0.1):
    kw, kb = jax.random.split(key)
    w = scale * jax.random.normal(kw, (din, dout), jnp.float32)
    b = scale * jax.random.normal(kb, (1, dout), jnp.float32)
    return w, b


def init_mlp(key, din, dh, dout):
    k1, k2 = jax.random.split(key)
    return {"l1": init_linear(k1, din, dh), "l2": init_linear(k2, dh, dout)}


def init_gnn(key, din, dh, num_layers):
    keys = jax.random.split(key, num_layers)
    layers = []
    in_dim = din
    for i in range(num_layers):
        layers.append(init_linear(keys[i], in_dim, dh))
        in_dim = dh
    return layers


def build_adj_with_self_loops(edge_index, n):
    """Dense B with B[i, j] = 1 iff edge j -> i (PyG src->tgt) or i == j.

    Note: duplicate edges collapse to weight 1 (matches the dense reference;
    differs from PyG message summation only if edge_index has duplicates).
    """
    src, tgt = edge_index[0], edge_index[1]
    adj = jnp.zeros((n, n), jnp.float32)
    adj = adj.at[tgt, src].set(1.0)
    idx = jnp.arange(n)
    adj = adj.at[idx, idx].set(1.0)
    return adj


# ----------------------------------------------------------------------------
# iMiracle forward (default flags: no saved outputs, no spatial loss)
# ----------------------------------------------------------------------------
def imiracle_forward(params, x_initial, edge_indices, grn_masks, output_dim):
    n, din = x_initial.shape
    terms = list(edge_indices.keys())
    num_terms = len(terms)

    bp = params["basic_mlp"]
    dh = bp["l1"][0].shape[1]

    # fused kernel assumes the module default gnn_layers=2
    for term in terms:
        assert len(params["gnns"][term]) == 2, "fused kernel expects 2 GCN layers"

    LANE = 128
    dout_pad = ((output_dim + LANE - 1) // LANE) * LANE

    def pad_cols(a, new_cols):
        return jnp.pad(a, ((0, 0), (0, new_cols - a.shape[1])))

    # ---- dense adjacency (bf16, exact for 0/1) + precomputed degree norm ----
    adj_f32 = jnp.stack(
        [build_adj_with_self_loops(edge_indices[t], n) for t in terms]
    )                                                    # [T, N, N] f32
    deg = jnp.sum(adj_f32, axis=2, keepdims=True)        # [T, N, 1]; >= 1
    dinv = jax.lax.rsqrt(deg)                            # [T, N, 1] f32
    adj = adj_f32.astype(jnp.bfloat16)                   # lossless for 0/1

    # ---- basic MLP params (second layer lane-padded to dout_pad) ------------
    bw1, bb1 = bp["l1"]
    bw2, bb2 = bp["l2"]
    bw2 = pad_cols(bw2, dout_pad)
    bb2 = pad_cols(bb2, dout_pad)

    # ---- stacked per-term GCN params ----------------------------------------
    gw1 = jnp.stack([params["gnns"][t][0][0] for t in terms])
    gb1 = jnp.stack([params["gnns"][t][0][1] for t in terms])
    gw2 = jnp.stack([params["gnns"][t][1][0] for t in terms])
    gb2 = jnp.stack([params["gnns"][t][1][1] for t in terms])
    dw1 = jnp.stack([params["decoders"][t]["l1"][0] for t in terms])
    db1 = jnp.stack([params["decoders"][t]["l1"][1] for t in terms])

    # ---- decoder layer 2: fold GRN mask (mask >= 0) and lane-pad ------------
    ones_mask = jnp.ones((1, output_dim), jnp.float32)
    dw2_list, db2_list = [], []
    for t in terms:
        w2, b2 = params["decoders"][t]["l2"]
        m = grn_masks.get(t, ones_mask)                  # requires m >= 0
        dw2_list.append(pad_cols(w2 * m, dout_pad))
        db2_list.append(pad_cols(b2 * m, dout_pad))
    dw2 = jnp.stack(dw2_list)
    db2 = jnp.stack(db2_list)

    # Full-array blocks, single grid step: everything resident in VMEM once.
    def full(shape):
        return pl.BlockSpec(shape, lambda i, _s=len(shape): (0,) * _s)

    kernel = functools.partial(_imiracle_fused_kernel, num_terms=num_terms)

    x_total_pad = pl.pallas_call(
        kernel,
        out_shape=jax.ShapeDtypeStruct((n, dout_pad), jnp.float32),
        grid=(1,),
        in_specs=[
            full((n, din)),
            full(bw1.shape), full(bb1.shape), full(bw2.shape), full(bb2.shape),
            full(adj.shape), full(dinv.shape),
            full(gw1.shape), full(gb1.shape), full(gw2.shape), full(gb2.shape),
            full(dw1.shape), full(db1.shape), full(dw2.shape), full(db2.shape),
        ],
        out_specs=pl.BlockSpec((n, dout_pad), lambda i: (0, 0)),
        compiler_params=pltpu.CompilerParams(
            dimension_semantics=("arbitrary",),
        ),
    )(
        x_initial,
        bw1, bb1, bw2, bb2,
        adj, dinv,
        gw1, gb1, gw2, gb2,
        dw1, db1, dw2, db2,
    )

    x_total = x_total_pad[:, :output_dim]

    spatial_loss_total = jnp.float32(0.0)
    # TODO(synk): spatial_loss (cdist + min/max normalize + MSE) only runs when
    #             compute_spatial_loss=True; not exercised in the default path.
    return x_total, spatial_loss_total


# ----------------------------------------------------------------------------
# Pure-JAX reference (f32 everywhere, for correctness check)
# ----------------------------------------------------------------------------
def _mlp_ref(x, p):
    h = jnp.maximum(x @ p["l1"][0] + p["l1"][1], 0.0)
    return jnp.maximum(h @ p["l2"][0] + p["l2"][1], 0.0)


def _gcn_ref(adj, x, w, b):
    deg = jnp.sum(adj, axis=1, keepdims=True)
    dinv = 1.0 / jnp.sqrt(deg)
    a_norm = dinv * adj * dinv.T
    return jnp.maximum(a_norm @ (x @ w) + b, 0.0)


def imiracle_ref(params, x_initial, edge_indices, grn_masks, output_dim):
    n = x_initial.shape[0]
    x_total = _mlp_ref(x_initial, params["basic_mlp"])
    ones_mask = jnp.ones((1, output_dim), jnp.float32)
    for term, edge_index in edge_indices.items():
        adj = build_adj_with_self_loops(edge_index, n)
        h = x_initial
        for (w, b) in params["gnns"][term]:
            h = _gcn_ref(adj, h, w, b)
        x_lr = _mlp_ref(h, params["decoders"][term])
        x_total = x_total + x_lr * grn_masks.get(term, ones_mask)
    return x_total


# ----------------------------------------------------------------------------
if __name__ == "__main__":
    key = jax.random.PRNGKey(0)
    N = 64          # number of nodes (spots/cells)
    INPUT_DIM = 16
    HIDDEN_DIM = 32
    OUTPUT_DIM = 16
    GNN_LAYERS = 2
    TERMS = ["ligrec_A", "ligrec_B"]   # multi-view graph interaction terms

    k_x, k_basic, k_g, k_d, k_e, k_grn = jax.random.split(key, 6)

    x_initial = jax.random.normal(k_x, (N, INPUT_DIM), jnp.float32)

    # deterministic parameter init (share_gnn=False, share_decoder=False)
    params = {
        "basic_mlp": init_mlp(k_basic, INPUT_DIM, HIDDEN_DIM, OUTPUT_DIM),
        "gnns": {},
        "decoders": {},
    }
    gk = jax.random.split(k_g, len(TERMS))
    dk = jax.random.split(k_d, len(TERMS))
    for i, term in enumerate(TERMS):
        params["gnns"][term] = init_gnn(gk[i], INPUT_DIM, HIDDEN_DIM, GNN_LAYERS)
        params["decoders"][term] = init_mlp(dk[i], HIDDEN_DIM, HIDDEN_DIM, OUTPUT_DIM)

    # synthetic multi-view edge indices (symmetric, no self loops)
    edge_indices = {}
    ek = jax.random.split(k_e, len(TERMS))
    E = 128
    for i, term in enumerate(TERMS):
        src = jax.random.randint(ek[i], (E,), 0, N)
        tgt = (src + 1 + jax.random.randint(jax.random.fold_in(ek[i], 1),
                                            (E,), 0, N - 1)) % N
        s = jnp.concatenate([src, tgt])
        t = jnp.concatenate([tgt, src])
        edge_indices[term] = jnp.stack([s, t], axis=0)  # [2, 2E]

    # GRN mask only for the first term (second term falls back to X_lr as-is)
    grn_masks = {
        TERMS[0]: (jax.random.uniform(k_grn, (1, OUTPUT_DIM)) > 0.5
                   ).astype(jnp.float32),
    }

    fwd = functools.partial(imiracle_forward, output_dim=OUTPUT_DIM)
    x_total, spatial_loss = fwd(params, x_initial, edge_indices, grn_masks)
    x_total = jax.block_until_ready(x_total)

    # correctness check vs pure-f32 JAX reference.  Tolerance is deliberately
    # loosened (2e-2) because the two [N, N] adjacency contractions run with
    # bf16 operands (f32 accumulation) on the MXU.
    x_ref = imiracle_ref(params, x_initial, edge_indices, grn_masks, OUTPUT_DIM)
    assert x_total.shape == (N, OUTPUT_DIM)
    assert jnp.allclose(x_total, x_ref, atol=2e-2, rtol=2e-2), "mismatch vs reference"

    print("KERNEL_OK")
</pallas_src>

<mosaic_0001>
module attributes {stable_mosaic.version = 11 : i64} {
  func.func @_imiracle_fused_kernel(%arg0: i32, %arg1: memref<64x16xf32, #tpu.memory_space<vmem>>, %arg2: memref<16x32xf32, #tpu.memory_space<vmem>>, %arg3: memref<1x32xf32, #tpu.memory_space<vmem>>, %arg4: memref<32x128xf32, #tpu.memory_space<vmem>>, %arg5: memref<1x128xf32, #tpu.memory_space<vmem>>, %arg6: memref<2x64x64xbf16, #tpu.memory_space<vmem>>, %arg7: memref<2x64x1xf32, #tpu.memory_space<vmem>>, %arg8: memref<2x16x32xf32, #tpu.memory_space<vmem>>, %arg9: memref<2x1x32xf32, #tpu.memory_space<vmem>>, %arg10: memref<2x32x32xf32, #tpu.memory_space<vmem>>, %arg11: memref<2x1x32xf32, #tpu.memory_space<vmem>>, %arg12: memref<2x32x32xf32, #tpu.memory_space<vmem>>, %arg13: memref<2x1x32xf32, #tpu.memory_space<vmem>>, %arg14: memref<2x32x128xf32, #tpu.memory_space<vmem>>, %arg15: memref<2x1x128xf32, #tpu.memory_space<vmem>>, %arg16: memref<64x128xf32, #tpu.memory_space<vmem>>) attributes {dimension_semantics = [#tpu.dimension_semantics<arbitrary>], iteration_bounds = array<i64: 1>, scalar_prefetch = 0 : i64, scratch_operands = 0 : i64, tpu.core_type = #tpu.core_type<tc>, window_params = [{pipeline_mode = #tpu.pipeline_mode<synchronous>, transform_indices = @transform_0, window_bounds = array<i64: 64, 16>}, {pipeline_mode = #tpu.pipeline_mode<synchronous>, transform_indices = @transform_1, window_bounds = array<i64: 16, 32>}, {pipeline_mode = #tpu.pipeline_mode<synchronous>, transform_indices = @transform_2, window_bounds = array<i64: 1, 32>}, {pipeline_mode = #tpu.pipeline_mode<synchronous>, transform_indices = @transform_3, window_bounds = array<i64: 32, 128>}, {pipeline_mode = #tpu.pipeline_mode<synchronous>, transform_indices = @transform_4, window_bounds = array<i64: 1, 128>}, {pipeline_mode = #tpu.pipeline_mode<synchronous>, transform_indices = @transform_5, window_bounds = array<i64: 2, 64, 64>}, {pipeline_mode = #tpu.pipeline_mode<synchronous>, transform_indices = @transform_6, window_bounds = array<i64: 2, 64, 1>}, {pipeline_mode = #tpu.pipeline_mode<synchronous>, transform_indices = @transform_7, window_bounds = array<i64: 2, 16, 32>}, {pipeline_mode = #tpu.pipeline_mode<synchronous>, transform_indices = @transform_8, window_bounds = array<i64: 2, 1, 32>}, {pipeline_mode = #tpu.pipeline_mode<synchronous>, transform_indices = @transform_9, window_bounds = array<i64: 2, 32, 32>}, {pipeline_mode = #tpu.pipeline_mode<synchronous>, transform_indices = @transform_10, window_bounds = array<i64: 2, 1, 32>}, {pipeline_mode = #tpu.pipeline_mode<synchronous>, transform_indices = @transform_11, window_bounds = array<i64: 2, 32, 32>}, {pipeline_mode = #tpu.pipeline_mode<synchronous>, transform_indices = @transform_12, window_bounds = array<i64: 2, 1, 32>}, {pipeline_mode = #tpu.pipeline_mode<synchronous>, transform_indices = @transform_13, window_bounds = array<i64: 2, 32, 128>}, {pipeline_mode = #tpu.pipeline_mode<synchronous>, transform_indices = @transform_14, window_bounds = array<i64: 2, 1, 128>}, {pipeline_mode = #tpu.pipeline_mode<synchronous>, transform_indices = @transform_15, window_bounds = array<i64: 64, 128>}]} {
    %c0 = arith.constant 0 : index
    %c0_0 = arith.constant 0 : index
    %0 = vector.load %arg1[%c0, %c0_0] : memref<64x16xf32, #tpu.memory_space<vmem>>, vector<64x16xf32>
    %c0_1 = arith.constant 0 : index
    %c0_2 = arith.constant 0 : index
    %1 = vector.load %arg2[%c0_1, %c0_2] : memref<16x32xf32, #tpu.memory_space<vmem>>, vector<16x32xf32>
    %cst = arith.constant dense<0.000000e+00> : vector<64x32xf32>
    %2 = tpu.matmul %0, %1, %cst {dimension_numbers = #tpu.dot_dimension_numbers<[1], [0], [0], [1], [0, 0, 1, 1], [], []>} : vector<64x16xf32>, vector<16x32xf32>, vector<64x32xf32> -> vector<64x32xf32>
    %c0_3 = arith.constant 0 : index
    %c0_4 = arith.constant 0 : index
    %3 = vector.load %arg3[%c0_3, %c0_4] : memref<1x32xf32, #tpu.memory_space<vmem>>, vector<1x32xf32>
    %4 = vector.broadcast %3 : vector<1x32xf32> to vector<64x32xf32>
    %5 = arith.addf %2, %4 : vector<64x32xf32>
    %cst_5 = arith.constant 0.000000e+00 : f32
    %6 = vector.broadcast %cst_5 : f32 to vector<64x32xf32>
    %7 = arith.maximumf %5, %6 : vector<64x32xf32>
    %c0_6 = arith.constant 0 : index
    %c0_7 = arith.constant 0 : index
    %8 = vector.load %arg4[%c0_6, %c0_7] : memref<32x128xf32, #tpu.memory_space<vmem>>, vector<32x128xf32>
    %cst_8 = arith.constant dense<0.000000e+00> : vector<64x128xf32>
    %9 = tpu.matmul %7, %8, %cst_8 {dimension_numbers = #tpu.dot_dimension_numbers<[1], [0], [0], [1], [0, 0, 1, 1], [], []>} : vector<64x32xf32>, vector<32x128xf32>, vector<64x128xf32> -> vector<64x128xf32>
    %c0_9 = arith.constant 0 : index
    %c0_10 = arith.constant 0 : index
    %10 = vector.load %arg5[%c0_9, %c0_10] : memref<1x128xf32, #tpu.memory_space<vmem>>, vector<1x128xf32>
    %11 = vector.broadcast %10 : vector<1x128xf32> to vector<64x128xf32>
    %12 = arith.addf %9, %11 : vector<64x128xf32>
    %cst_11 = arith.constant 0.000000e+00 : f32
    %13 = vector.broadcast %cst_11 : f32 to vector<64x128xf32>
    %14 = arith.maximumf %12, %13 : vector<64x128xf32>
    %c0_12 = arith.constant 0 : index
    %c0_13 = arith.constant 0 : index
    %c0_14 = arith.constant 0 : index
    %15 = vector.load %arg6[%c0_12, %c0_13, %c0_14] : memref<2x64x64xbf16, #tpu.memory_space<vmem>>, vector<1x64x64xbf16>
    %16 = vector.shape_cast %15 : vector<1x64x64xbf16> to vector<64x64xbf16>
    %c0_15 = arith.constant 0 : index
    %c0_16 = arith.constant 0 : index
    %c0_17 = arith.constant 0 : index
    %17 = vector.load %arg7[%c0_15, %c0_16, %c0_17] : memref<2x64x1xf32, #tpu.memory_space<vmem>>, vector<1x64x1xf32>
    %18 = vector.shape_cast %17 : vector<1x64x1xf32> to vector<64x1xf32>
    %19 = vector.broadcast %18 : vector<64x1xf32> to vector<64x16xf32>
    %20 = arith.mulf %19, %0 : vector<64x16xf32>
    %21 = arith.truncf %20 : vector<64x16xf32> to vector<64x16xbf16>
    %cst_18 = arith.constant dense<0.000000e+00> : vector<64x16xf32>
    %22 = tpu.matmul %16, %21, %cst_18 {dimension_numbers = #tpu.dot_dimension_numbers<[1], [0], [0], [1], [0, 0, 1, 1], [], []>} : vector<64x64xbf16>, vector<64x16xbf16>, vector<64x16xf32> -> vector<64x16xf32>
    %23 = vector.broadcast %18 : vector<64x1xf32> to vector<64x16xf32>
    %24 = arith.mulf %23, %22 : vector<64x16xf32>
    %c0_19 = arith.constant 0 : index
    %c0_20 = arith.constant 0 : index
    %c0_21 = arith.constant 0 : index
    %25 = vector.load %arg8[%c0_19, %c0_20, %c0_21] : memref<2x16x32xf32, #tpu.memory_space<vmem>>, vector<1x16x32xf32>
    %26 = vector.shape_cast %25 : vector<1x16x32xf32> to vector<16x32xf32>
    %cst_22 = arith.constant dense<0.000000e+00> : vector<64x32xf32>
    %27 = tpu.matmul %24, %26, %cst_22 {dimension_numbers = #tpu.dot_dimension_numbers<[1], [0], [0], [1], [0, 0, 1, 1], [], []>} : vector<64x16xf32>, vector<16x32xf32>, vector<64x32xf32> -> vector<64x32xf32>
    %c0_23 = arith.constant 0 : index
    %c0_24 = arith.constant 0 : index
    %c0_25 = arith.constant 0 : index
    %28 = vector.load %arg9[%c0_23, %c0_24, %c0_25] : memref<2x1x32xf32, #tpu.memory_space<vmem>>, vector<1x1x32xf32>
    %29 = vector.shape_cast %28 : vector<1x1x32xf32> to vector<1x32xf32>
    %30 = vector.broadcast %29 : vector<1x32xf32> to vector<64x32xf32>
    %31 = arith.addf %27, %30 : vector<64x32xf32>
    %cst_26 = arith.constant 0.000000e+00 : f32
    %32 = vector.broadcast %cst_26 : f32 to vector<64x32xf32>
    %33 = arith.maximumf %31, %32 : vector<64x32xf32>
    %34 = vector.broadcast %18 : vector<64x1xf32> to vector<64x32xf32>
    %35 = arith.mulf %34, %33 : vector<64x32xf32>
    %36 = arith.truncf %35 : vector<64x32xf32> to vector<64x32xbf16>
    %cst_27 = arith.constant dense<0.000000e+00> : vector<64x32xf32>
    %37 = tpu.matmul %16, %36, %cst_27 {dimension_numbers = #tpu.dot_dimension_numbers<[1], [0], [0], [1], [0, 0, 1, 1], [], []>} : vector<64x64xbf16>, vector<64x32xbf16>, vector<64x32xf32> -> vector<64x32xf32>
    %38 = vector.broadcast %18 : vector<64x1xf32> to vector<64x32xf32>
    %39 = arith.mulf %38, %37 : vector<64x32xf32>
    %c0_28 = arith.constant 0 : index
    %c0_29 = arith.constant 0 : index
    %c0_30 = arith.constant 0 : index
    %40 = vector.load %arg10[%c0_28, %c0_29, %c0_30] : memref<2x32x32xf32, #tpu.memory_space<vmem>>, vector<1x32x32xf32>
    %41 = vector.shape_cast %40 : vector<1x32x32xf32> to vector<32x32xf32>
    %cst_31 = arith.constant dense<0.000000e+00> : vector<64x32xf32>
    %42 = tpu.matmul %39, %41, %cst_31 {dimension_numbers = #tpu.dot_dimension_numbers<[1], [0], [0], [1], [0, 0, 1, 1], [], []>} : vector<64x32xf32>, vector<32x32xf32>, vector<64x32xf32> -> vector<64x32xf32>
    %c0_32 = arith.constant 0 : index
    %c0_33 = arith.constant 0 : index
    %c0_34 = arith.constant 0 : index
    %43 = vector.load %arg11[%c0_32, %c0_33, %c0_34] : memref<2x1x32xf32, #tpu.memory_space<vmem>>, vector<1x1x32xf32>
    %44 = vector.shape_cast %43 : vector<1x1x32xf32> to vector<1x32xf32>
    %45 = vector.broadcast %44 : vector<1x32xf32> to vector<64x32xf32>
    %46 = arith.addf %42, %45 : vector<64x32xf32>
    %cst_35 = arith.constant 0.000000e+00 : f32
    %47 = vector.broadcast %cst_35 : f32 to vector<64x32xf32>
    %48 = arith.maximumf %46, %47 : vector<64x32xf32>
    %c0_36 = arith.constant 0 : index
    %c0_37 = arith.constant 0 : index
    %c0_38 = arith.constant 0 : index
    %49 = vector.load %arg12[%c0_36, %c0_37, %c0_38] : memref<2x32x32xf32, #tpu.memory_space<vmem>>, vector<1x32x32xf32>
    %50 = vector.shape_cast %49 : vector<1x32x32xf32> to vector<32x32xf32>
    %cst_39 = arith.constant dense<0.000000e+00> : vector<64x32xf32>
    %51 = tpu.matmul %48, %50, %cst_39 {dimension_numbers = #tpu.dot_dimension_numbers<[1], [0], [0], [1], [0, 0, 1, 1], [], []>} : vector<64x32xf32>, vector<32x32xf32>, vector<64x32xf32> -> vector<64x32xf32>
    %c0_40 = arith.constant 0 : index
    %c0_41 = arith.constant 0 : index
    %c0_42 = arith.constant 0 : index
    %52 = vector.load %arg13[%c0_40, %c0_41, %c0_42] : memref<2x1x32xf32, #tpu.memory_space<vmem>>, vector<1x1x32xf32>
    %53 = vector.shape_cast %52 : vector<1x1x32xf32> to vector<1x32xf32>
    %54 = vector.broadcast %53 : vector<1x32xf32> to vector<64x32xf32>
    %55 = arith.addf %51, %54 : vector<64x32xf32>
    %cst_43 = arith.constant 0.000000e+00 : f32
    %56 = vector.broadcast %cst_43 : f32 to vector<64x32xf32>
    %57 = arith.maximumf %55, %56 : vector<64x32xf32>
    %c0_44 = arith.constant 0 : index
    %c0_45 = arith.constant 0 : index
    %c0_46 = arith.constant 0 : index
    %58 = vector.load %arg14[%c0_44, %c0_45, %c0_46] : memref<2x32x128xf32, #tpu.memory_space<vmem>>, vector<1x32x128xf32>
    %59 = vector.shape_cast %58 : vector<1x32x128xf32> to vector<32x128xf32>
    %cst_47 = arith.constant dense<0.000000e+00> : vector<64x128xf32>
    %60 = tpu.matmul %57, %59, %cst_47 {dimension_numbers = #tpu.dot_dimension_numbers<[1], [0], [0], [1], [0, 0, 1, 1], [], []>} : vector<64x32xf32>, vector<32x128xf32>, vector<64x128xf32> -> vector<64x128xf32>
    %c0_48 = arith.constant 0 : index
    %c0_49 = arith.constant 0 : index
    %c0_50 = arith.constant 0 : index
    %61 = vector.load %arg15[%c0_48, %c0_49, %c0_50] : memref<2x1x128xf32, #tpu.memory_space<vmem>>, vector<1x1x128xf32>
    %62 = vector.shape_cast %61 : vector<1x1x128xf32> to vector<1x128xf32>
    %63 = vector.broadcast %62 : vector<1x128xf32> to vector<64x128xf32>
    %64 = arith.addf %60, %63 : vector<64x128xf32>
    %cst_51 = arith.constant 0.000000e+00 : f32
    %65 = vector.broadcast %cst_51 : f32 to vector<64x128xf32>
    %66 = arith.maximumf %64, %65 : vector<64x128xf32>
    %67 = arith.addf %14, %66 : vector<64x128xf32>
    %c1 = arith.constant 1 : index
    %c0_52 = arith.constant 0 : index
    %c0_53 = arith.constant 0 : index
    %68 = vector.load %arg6[%c1, %c0_52, %c0_53] : memref<2x64x64xbf16, #tpu.memory_space<vmem>>, vector<1x64x64xbf16>
    %69 = vector.shape_cast %68 : vector<1x64x64xbf16> to vector<64x64xbf16>
    %c1_54 = arith.constant 1 : index
    %c0_55 = arith.constant 0 : index
    %c0_56 = arith.constant 0 : index
    %70 = vector.load %arg7[%c1_54, %c0_55, %c0_56] : memref<2x64x1xf32, #tpu.memory_space<vmem>>, vector<1x64x1xf32>
    %71 = vector.shape_cast %70 : vector<1x64x1xf32> to vector<64x1xf32>
    %72 = vector.broadcast %71 : vector<64x1xf32> to vector<64x16xf32>
    %73 = arith.mulf %72, %0 : vector<64x16xf32>
    %74 = arith.truncf %73 : vector<64x16xf32> to vector<64x16xbf16>
    %cst_57 = arith.constant dense<0.000000e+00> : vector<64x16xf32>
    %75 = tpu.matmul %69, %74, %cst_57 {dimension_numbers = #tpu.dot_dimension_numbers<[1], [0], [0], [1], [0, 0, 1, 1], [], []>} : vector<64x64xbf16>, vector<64x16xbf16>, vector<64x16xf32> -> vector<64x16xf32>
    %76 = vector.broadcast %71 : vector<64x1xf32> to vector<64x16xf32>
    %77 = arith.mulf %76, %75 : vector<64x16xf32>
    %c1_58 = arith.constant 1 : index
    %c0_59 = arith.constant 0 : index
    %c0_60 = arith.constant 0 : index
    %78 = vector.load %arg8[%c1_58, %c0_59, %c0_60] : memref<2x16x32xf32, #tpu.memory_space<vmem>>, vector<1x16x32xf32>
    %79 = vector.shape_cast %78 : vector<1x16x32xf32> to vector<16x32xf32>
    %cst_61 = arith.constant dense<0.000000e+00> : vector<64x32xf32>
    %80 = tpu.matmul %77, %79, %cst_61 {dimension_numbers = #tpu.dot_dimension_numbers<[1], [0], [0], [1], [0, 0, 1, 1], [], []>} : vector<64x16xf32>, vector<16x32xf32>, vector<64x32xf32> -> vector<64x32xf32>
    %c1_62 = arith.constant 1 : index
    %c0_63 = arith.constant 0 : index
    %c0_64 = arith.constant 0 : index
    %81 = vector.load %arg9[%c1_62, %c0_63, %c0_64] : memref<2x1x32xf32, #tpu.memory_space<vmem>>, vector<1x1x32xf32>
    %82 = vector.shape_cast %81 : vector<1x1x32xf32> to vector<1x32xf32>
    %83 = vector.broadcast %82 : vector<1x32xf32> to vector<64x32xf32>
    %84 = arith.addf %80, %83 : vector<64x32xf32>
    %cst_65 = arith.constant 0.000000e+00 : f32
    %85 = vector.broadcast %cst_65 : f32 to vector<64x32xf32>
    %86 = arith.maximumf %84, %85 : vector<64x32xf32>
    %87 = vector.broadcast %71 : vector<64x1xf32> to vector<64x32xf32>
    %88 = arith.mulf %87, %86 : vector<64x32xf32>
    %89 = arith.truncf %88 : vector<64x32xf32> to vector<64x32xbf16>
    %cst_66 = arith.constant dense<0.000000e+00> : vector<64x32xf32>
    %90 = tpu.matmul %69, %89, %cst_66 {dimension_numbers = #tpu.dot_dimension_numbers<[1], [0], [0], [1], [0, 0, 1, 1], [], []>} : vector<64x64xbf16>, vector<64x32xbf16>, vector<64x32xf32> -> vector<64x32xf32>
    %91 = vector.broadcast %71 : vector<64x1xf32> to vector<64x32xf32>
    %92 = arith.mulf %91, %90 : vector<64x32xf32>
    %c1_67 = arith.constant 1 : index
    %c0_68 = arith.constant 0 : index
    %c0_69 = arith.constant 0 : index
    %93 = vector.load %arg10[%c1_67, %c0_68, %c0_69] : memref<2x32x32xf32, #tpu.memory_space<vmem>>, vector<1x32x32xf32>
    %94 = vector.shape_cast %93 : vector<1x32x32xf32> to vector<32x32xf32>
    %cst_70 = arith.constant dense<0.000000e+00> : vector<64x32xf32>
    %95 = tpu.matmul %92, %94, %cst_70 {dimension_numbers = #tpu.dot_dimension_numbers<[1], [0], [0], [1], [0, 0, 1, 1], [], []>} : vector<64x32xf32>, vector<32x32xf32>, vector<64x32xf32> -> vector<64x32xf32>
    %c1_71 = arith.constant 1 : index
    %c0_72 = arith.constant 0 : index
    %c0_73 = arith.constant 0 : index
    %96 = vector.load %arg11[%c1_71, %c0_72, %c0_73] : memref<2x1x32xf32, #tpu.memory_space<vmem>>, vector<1x1x32xf32>
    %97 = vector.shape_cast %96 : vector<1x1x32xf32> to vector<1x32xf32>
    %98 = vector.broadcast %97 : vector<1x32xf32> to vector<64x32xf32>
    %99 = arith.addf %95, %98 : vector<64x32xf32>
    %cst_74 = arith.constant 0.000000e+00 : f32
    %100 = vector.broadcast %cst_74 : f32 to vector<64x32xf32>
    %101 = arith.maximumf %99, %100 : vector<64x32xf32>
    %c1_75 = arith.constant 1 : index
    %c0_76 = arith.constant 0 : index
    %c0_77 = arith.constant 0 : index
    %102 = vector.load %arg12[%c1_75, %c0_76, %c0_77] : memref<2x32x32xf32, #tpu.memory_space<vmem>>, vector<1x32x32xf32>
    %103 = vector.shape_cast %102 : vector<1x32x32xf32> to vector<32x32xf32>
    %cst_78 = arith.constant dense<0.000000e+00> : vector<64x32xf32>
    %104 = tpu.matmul %101, %103, %cst_78 {dimension_numbers = #tpu.dot_dimension_numbers<[1], [0], [0], [1], [0, 0, 1, 1], [], []>} : vector<64x32xf32>, vector<32x32xf32>, vector<64x32xf32> -> vector<64x32xf32>
    %c1_79 = arith.constant 1 : index
    %c0_80 = arith.constant 0 : index
    %c0_81 = arith.constant 0 : index
    %105 = vector.load %arg13[%c1_79, %c0_80, %c0_81] : memref<2x1x32xf32, #tpu.memory_space<vmem>>, vector<1x1x32xf32>
    %106 = vector.shape_cast %105 : vector<1x1x32xf32> to vector<1x32xf32>
    %107 = vector.broadcast %106 : vector<1x32xf32> to vector<64x32xf32>
    %108 = arith.addf %104, %107 : vector<64x32xf32>
    %cst_82 = arith.constant 0.000000e+00 : f32
    %109 = vector.broadcast %cst_82 : f32 to vector<64x32xf32>
    %110 = arith.maximumf %108, %109 : vector<64x32xf32>
    %c1_83 = arith.constant 1 : index
    %c0_84 = arith.constant 0 : index
    %c0_85 = arith.constant 0 : index
    %111 = vector.load %arg14[%c1_83, %c0_84, %c0_85] : memref<2x32x128xf32, #tpu.memory_space<vmem>>, vector<1x32x128xf32>
    %112 = vector.shape_cast %111 : vector<1x32x128xf32> to vector<32x128xf32>
    %cst_86 = arith.constant dense<0.000000e+00> : vector<64x128xf32>
    %113 = tpu.matmul %110, %112, %cst_86 {dimension_numbers = #tpu.dot_dimension_numbers<[1], [0], [0], [1], [0, 0, 1, 1], [], []>} : vector<64x32xf32>, vector<32x128xf32>, vector<64x128xf32> -> vector<64x128xf32>
    %c1_87 = arith.constant 1 : index
    %c0_88 = arith.constant 0 : index
    %c0_89 = arith.constant 0 : index
    %114 = vector.load %arg15[%c1_87, %c0_88, %c0_89] : memref<2x1x128xf32, #tpu.memory_space<vmem>>, vector<1x1x128xf32>
    %115 = vector.shape_cast %114 : vector<1x1x128xf32> to vector<1x128xf32>
    %116 = vector.broadcast %115 : vector<1x128xf32> to vector<64x128xf32>
    %117 = arith.addf %113, %116 : vector<64x128xf32>
    %cst_90 = arith.constant 0.000000e+00 : f32
    %118 = vector.broadcast %cst_90 : f32 to vector<64x128xf32>
    %119 = arith.maximumf %117, %118 : vector<64x128xf32>
    %120 = arith.addf %67, %119 : vector<64x128xf32>
    %c0_91 = arith.constant 0 : index
    %c0_92 = arith.constant 0 : index
    %121 = vector.load %arg16[%c0_91, %c0_92] : memref<64x128xf32, #tpu.memory_space<vmem>>, vector<64x128xf32>
    tpu.vector_store %arg16[%c0_91, %c0_92], %120 {strides = array<i32>} : memref<64x128xf32, #tpu.memory_space<vmem>>, vector<64x128xf32>,
    return
  }
  func.func @transform_0(%arg0: i32) -> (i32, i32) {
    %c0_i32 = arith.constant 0 : i32
    %c0_i32_0 = arith.constant 0 : i32
    %c0_i32_1 = arith.constant 0 : i32
    return %c0_i32, %c0_i32_0 : i32, i32
  }
  func.func @transform_1(%arg0: i32) -> (i32, i32) {
    %c0_i32 = arith.constant 0 : i32
    %c0_i32_0 = arith.constant 0 : i32
    %c0_i32_1 = arith.constant 0 : i32
    return %c0_i32, %c0_i32_0 : i32, i32
  }
  func.func @transform_2(%arg0: i32) -> (i32, i32) {
    %c0_i32 = arith.constant 0 : i32
    %c0_i32_0 = arith.constant 0 : i32
    %c0_i32_1 = arith.constant 0 : i32
    return %c0_i32, %c0_i32_0 : i32, i32
  }
  func.func @transform_3(%arg0: i32) -> (i32, i32) {
    %c0_i32 = arith.constant 0 : i32
    %c0_i32_0 = arith.constant 0 : i32
    %c0_i32_1 = arith.constant 0 : i32
    return %c0_i32, %c0_i32_0 : i32, i32
  }
  func.func @transform_4(%arg0: i32) -> (i32, i32) {
    %c0_i32 = arith.constant 0 : i32
    %c0_i32_0 = arith.constant 0 : i32
    %c0_i32_1 = arith.constant 0 : i32
    return %c0_i32, %c0_i32_0 : i32, i32
  }
  func.func @transform_5(%arg0: i32) -> (i32, i32, i32) {
    %c0_i32 = arith.constant 0 : i32
    %c0_i32_0 = arith.constant 0 : i32
    %c0_i32_1 = arith.constant 0 : i32
    %c0_i32_2 = arith.constant 0 : i32
    return %c0_i32, %c0_i32_0, %c0_i32_1 : i32, i32, i32
  }
  func.func @transform_6(%arg0: i32) -> (i32, i32, i32) {
    %c0_i32 = arith.constant 0 : i32
    %c0_i32_0 = arith.constant 0 : i32
    %c0_i32_1 = arith.constant 0 : i32
    %c0_i32_2 = arith.constant 0 : i32
    return %c0_i32, %c0_i32_0, %c0_i32_1 : i32, i32, i32
  }
  func.func @transform_7(%arg0: i32) -> (i32, i32, i32) {
    %c0_i32 = arith.constant 0 : i32
    %c0_i32_0 = arith.constant 0 : i32
    %c0_i32_1 = arith.constant 0 : i32
    %c0_i32_2 = arith.constant 0 : i32
    return %c0_i32, %c0_i32_0, %c0_i32_1 : i32, i32, i32
  }
  func.func @transform_8(%arg0: i32) -> (i32, i32, i32) {
    %c0_i32 = arith.constant 0 : i32
    %c0_i32_0 = arith.constant 0 : i32
    %c0_i32_1 = arith.constant 0 : i32
    %c0_i32_2 = arith.constant 0 : i32
    return %c0_i32, %c0_i32_0, %c0_i32_1 : i32, i32, i32
  }
  func.func @transform_9(%arg0: i32) -> (i32, i32, i32) {
    %c0_i32 = arith.constant 0 : i32
    %c0_i32_0 = arith.constant 0 : i32
    %c0_i32_1 = arith.constant 0 : i32
    %c0_i32_2 = arith.constant 0 : i32
    return %c0_i32, %c0_i32_0, %c0_i32_1 : i32, i32, i32
  }
  func.func @transform_10(%arg0: i32) -> (i32, i32, i32) {
    %c0_i32 = arith.constant 0 : i32
    %c0_i32_0 = arith.constant 0 : i32
    %c0_i32_1 = arith.constant 0 : i32
    %c0_i32_2 = arith.constant 0 : i32
    return %c0_i32, %c0_i32_0, %c0_i32_1 : i32, i32, i32
  }
  func.func @transform_11(%arg0: i32) -> (i32, i32, i32) {
    %c0_i32 = arith.constant 0 : i32
    %c0_i32_0 = arith.constant 0 : i32
    %c0_i32_1 = arith.constant 0 : i32
    %c0_i32_2 = arith.constant 0 : i32
    return %c0_i32, %c0_i32_0, %c0_i32_1 : i32, i32, i32
  }
  func.func @transform_12(%arg0: i32) -> (i32, i32, i32) {
    %c0_i32 = arith.constant 0 : i32
    %c0_i32_0 = arith.constant 0 : i32
    %c0_i32_1 = arith.constant 0 : i32
    %c0_i32_2 = arith.constant 0 : i32
    return %c0_i32, %c0_i32_0, %c0_i32_1 : i32, i32, i32
  }
  func.func @transform_13(%arg0: i32) -> (i32, i32, i32) {
    %c0_i32 = arith.constant 0 : i32
    %c0_i32_0 = arith.constant 0 : i32
    %c0_i32_1 = arith.constant 0 : i32
    %c0_i32_2 = arith.constant 0 : i32
    return %c0_i32, %c0_i32_0, %c0_i32_1 : i32, i32, i32
  }
  func.func @transform_14(%arg0: i32) -> (i32, i32, i32) {
    %c0_i32 = arith.constant 0 : i32
    %c0_i32_0 = arith.constant 0 : i32
    %c0_i32_1 = arith.constant 0 : i32
    %c0_i32_2 = arith.constant 0 : i32
    return %c0_i32, %c0_i32_0, %c0_i32_1 : i32, i32, i32
  }
  func.func @transform_15(%arg0: i32) -> (i32, i32) {
    %c0_i32 = arith.constant 0 : i32
    %c0_i32_0 = arith.constant 0 : i32
    %c0_i32_1 = arith.constant 0 : i32
    return %c0_i32, %c0_i32_0 : i32, i32
  }
}

</mosaic_0001>

<bundles_post_ra>
// kernel: tpu_custom_call.1
= control target key start
LH: loop header
LB: loop body
LE: loop exit
PB: predicated region body
PF: predicated region fallthrough
CT: control target
= control target key end

     0   :  { %20 = vsyncpa [#allocation3], 0  ;;  %s3730_s0 = inlined_call_operand.vmem [shape: f32[64,16], index: 0, kind: input, shape index: {}]   ;;  %s3731_s1 = inlined_call_operand.hbm [shape: f32[16,32], index: 1, kind: input, shape index: {}]   ;;  %s3732_s2 = inlined_call_operand.vmem [shape: f32[1,32], index: 2, kind: input, shape index: {}]   ;;  %s3733_s3 = inlined_call_operand.hbm [shape: f32[32,128], index: 3, kind: input, shape index: {}]   ;;  %s3734_s4 = inlined_call_operand.hbm [shape: f32[1,128], index: 4, kind: input, shape index: {}]   ;;  %s3735_s5 = inlined_call_operand.vmem [shape: bf16[2,64,64], index: 5, kind: input, shape index: {}]   ;;  %s3736_s6 = inlined_call_operand.vmem [shape: f32[2,64,1], index: 6, kind: input, shape index: {}]   ;;  %s3737_s7 = inlined_call_operand.hbm [shape: f32[2,16,32], index: 7, kind: input, shape index: {}]   ;;  %s3738_s8 = inlined_call_operand.hbm [shape: f32[2,1,32], index: 8, kind: input, shape index: {}]   ;;  %s3739_s9 = inlined_call_operand.vmem [shape: f32[2,32,32], index: 9, kind: input, shape index: {}]   ;;  %s3740_s10 = inlined_call_operand.hbm [shape: f32[2,1,32], index: 10, kind: input, shape index: {}]   ;;  %s3741_s11 = inlined_call_operand.vmem [shape: f32[2,32,32], index: 11, kind: input, shape index: {}]   ;;  %s3742_s12 = inlined_call_operand.hbm [shape: f32[2,1,32], index: 12, kind: input, shape index: {}]   ;;  %s3743_s13 = inlined_call_operand.vmem [shape: f32[2,32,128], index: 13, kind: input, shape index: {}]   ;;  %s3744_s14 = inlined_call_operand.vmem [shape: f32[2,1,128], index: 14, kind: input, shape index: {}]   ;;  %s3745_s15 = inlined_call_operand.hbm [shape: f32[64,128], index: 15, kind: output, shape index: {}]  }
   0x1   :  { %21 = vsyncpa [#allocation6], 0 }
   0x2   :  { %22 = vsyncpa [#allocation9], 0 }
   0x3   :  { %23 = vsyncpa [#allocation12], 0 }
   0x4   :  { %24 = vsyncpa [#allocation4], 0  ;;  %s3018_s18 = smov [#allocation5]   ;;  %s3019_s20 = smov [#allocation8]  }
   0x5   :  { %s46_s19 = sshll.u32 %s3018_s18, 4  ;;  %s72_s21 = sshll.u32 %s3019_s20, 4  ;;  %s47_s19 = int_to_ptr.vmem [resolvable:$true] %s46_s19  ;;  %s3111_s21 = int_to_ptr.vmem [resolvable:$true] %s72_s21 }
   0x6   :  { %s2832_s24 = scalar_lea.hbm %s3733_s3, 512 }
   0x7   :  { %p2833_p0 = scmp.ne.s32.totalorder %s3733_s3, %s2832_s24  ;;  %p2836_p1 = scmp.lt.u32.totalorder %s2832_s24, %s3733_s3 }
   0x9   :  { %p2838_p2 = pnand %p2836_p1, %p2833_p0 }
   0xb   :  { %2841 = shalt.err (!%p2838_p2)
}
   0xc   :  { %s2842_s29 = scalar_lea.vmem %s47_s19, 512  ;;  %p2847_p4 = scmp.lt.s32.totalorder %s47_s19, %s47_s19 }
   0xd   :  { %p2843_p3 = scmp.ne.s32.totalorder %s47_s19, %s2842_s29  ;;  %p2848_p5 = scmp.lt.s32.totalorder %s2842_s29, %s2842_s29 }
   0xf   :  { %p2849_p6 = por %p2848_p5, %p2847_p4 }
  0x11   :  { %p2850_p7 = pnand %p2849_p6, %p2843_p3 }
  0x13   :  { %2853 = shalt.err (!%p2850_p7)
}
  0x14   :  { %s3020_s30 = smov 128   ;;  %s3021_s16 = smov 8  }
  0x15   :  { %52 = dma.hbm_to_vmem [thread:$0]  %s3733_s3, 512, %s47_s19, [#allocation6], %s3020_s30, %s3020_s30, %s3021_s16  }
  0x16   :  { %s2854_s23 = scalar_lea.hbm %s3737_s7, 512 }
  0x17   :  { %p2855_p8 = scmp.ne.s32.totalorder %s3737_s7, %s2854_s23  ;;  %p2858_p9 = scmp.lt.u32.totalorder %s2854_s23, %s3737_s7 }
  0x19   :  { %p2860_p10 = pnand %p2858_p9, %p2855_p8 }
  0x1b   :  { %2863 = shalt.err (!%p2860_p10)
}
  0x1c   :  { %s2864_s28 = scalar_lea.vmem %s3111_s21, 512  ;;  %p2869_p12 = scmp.lt.s32.totalorder %s3111_s21, %s3111_s21 }
  0x1d   :  { %p2865_p11 = scmp.ne.s32.totalorder %s3111_s21, %s2864_s28  ;;  %p2870_p13 = scmp.lt.s32.totalorder %s2864_s28, %s2864_s28 }
  0x1f   :  { %p2871_p0 = por %p2870_p13, %p2869_p12 }
  0x21   :  { %p2872_p1 = pnand %p2871_p0, %p2865_p11 }
  0x23   :  { %2875 = shalt.err (!%p2872_p1)
}
  0x24   :  { %78 = dma.hbm_to_vmem [thread:$0]  %s3737_s7, 512, %s3111_s21, [#allocation9], %s3020_s30, %s3020_s30, %s3021_s16  }
  0x25   :  { %s3022_s29 = smov [#allocation11]   ;;  %s3023_s18 = smov [#allocation2]  }
  0x26   :  { %s98_s17 = sshll.u32 %s3022_s29, 4  ;;  %s32_s20 = sshll.u32 %s3023_s18, 4  ;;  %s99_s17 = int_to_ptr.vmem [resolvable:$true] %s98_s17  ;;  %s3148_s20 = int_to_ptr.vmem [resolvable:$true] %s32_s20 }
  0x27   :  { %s2876_s24 = scalar_lea.hbm %s3740_s10, 32 }
  0x28   :  { %p2877_p2 = scmp.ne.s32.totalorder %s3740_s10, %s2876_s24  ;;  %p2880_p3 = scmp.lt.u32.totalorder %s2876_s24, %s3740_s10 }
  0x2a   :  { %p2882_p4 = pnand %p2880_p3, %p2877_p2 }
  0x2c   :  { %2885 = shalt.err (!%p2882_p4)
}
  0x2d   :  { %s2886_s7 = scalar_lea.vmem %s99_s17, 32  ;;  %p2891_p6 = scmp.lt.s32.totalorder %s99_s17, %s99_s17 }
  0x2e   :  { %p2887_p5 = scmp.ne.s32.totalorder %s99_s17, %s2886_s7  ;;  %p2892_p7 = scmp.lt.s32.totalorder %s2886_s7, %s2886_s7 }
  0x30   :  { %p2893_p8 = por %p2892_p7, %p2891_p6 }
  0x32   :  { %p2894_p9 = pnand %p2893_p8, %p2887_p5 }
  0x34   :  { %2897 = shalt.err (!%p2894_p9)
}
  0x35   :  { %s3024_s21 = smov 16   ;;  %s3025_s3 = smov 1  }
  0x36   :  { %104 = dma.hbm_to_vmem [thread:$0]  %s3740_s10, 32, %s99_s17, [#allocation12], %s3024_s21, %s3024_s21, %s3025_s3  }
  0x37   :  { %s2898_s23 = scalar_lea.hbm %s3731_s1, 256 }
  0x38   :  { %p2899_p10 = scmp.ne.s32.totalorder %s3731_s1, %s2898_s23  ;;  %p2902_p11 = scmp.lt.u32.totalorder %s2898_s23, %s3731_s1 }
  0x3a   :  { %p2904_p12 = pnand %p2902_p11, %p2899_p10 }
  0x3c   :  { %2907 = shalt.err (!%p2904_p12)
}
  0x3d   :  { %s2908_s28 = scalar_lea.vmem %s3148_s20, 256  ;;  %p2913_p0 = scmp.lt.s32.totalorder %s3148_s20, %s3148_s20 }
  0x3e   :  { %p2909_p13 = scmp.ne.s32.totalorder %s3148_s20, %s2908_s28  ;;  %p2914_p1 = scmp.lt.s32.totalorder %s2908_s28, %s2908_s28 }
  0x40   :  { %p2915_p2 = por %p2914_p1, %p2913_p0 }
  0x42   :  { %p2916_p3 = pnand %p2915_p2, %p2909_p13 }
  0x44   :  { %2919 = shalt.err (!%p2916_p3)
}
  0x45   :  { %38 = dma.hbm_to_vmem [thread:$0]  %s3731_s1, 256, %s3148_s20, [#allocation3], %s3020_s30, %s3020_s30, %s3021_s16  }
  0x46   :  { %s3026_s7 = smov [#allocation7]   ;;  %s3027_s29 = smov [#allocation10]  }
  0x47   :  { %s59_s19 = sshll.u32 %s3026_s7, 4  ;;  %s84_s18 = sshll.u32 %s3027_s29, 4  ;;  %s60_s19 = int_to_ptr.vmem [resolvable:$true] %s59_s19  ;;  %s3185_s18 = int_to_ptr.vmem [resolvable:$true] %s84_s18 }
  0x48   :  { %s2920_s24 = scalar_lea.hbm %s3734_s4, 16 }
  0x49   :  { %p2921_p4 = scmp.ne.s32.totalorder %s3734_s4, %s2920_s24  ;;  %p2924_p5 = scmp.lt.u32.totalorder %s2920_s24, %s3734_s4 }
  0x4b   :  { %p2926_p6 = pnand %p2924_p5, %p2921_p4 }
  0x4d   :  { %2929 = shalt.err (!%p2926_p6)
}
  0x4e   :  { %s2930_s1 = scalar_lea.vmem %s60_s19, 16  ;;  %s2934_s20 = scalar_lea.vmem %s60_s19, 32 }
  0x4f   :  { %p2931_p7 = scmp.ne.s32.totalorder %s60_s19, %s2930_s1  ;;  %p2935_p8 = scmp.lt.s32.totalorder %s60_s19, %s60_s19 }
  0x50   :  { %p2936_p9 = scmp.lt.s32.totalorder %s2934_s20, %s2930_s1 }
  0x52   :  { %p2937_p10 = por %p2936_p9, %p2935_p8 }
  0x54   :  { %p2938_p11 = pnand %p2937_p10, %p2931_p7 }
  0x56   :  { %2941 = shalt.err (!%p2938_p11)
}
  0x57   :  { %62 = dma.hbm_to_vmem [thread:$0]  %s3734_s4, 16, %s60_s19, [#allocation6]  }
  0x58   :  { %s2942_s22 = scalar_lea.hbm %s3738_s8, 32 }
  0x59   :  { %p2943_p12 = scmp.ne.s32.totalorder %s3738_s8, %s2942_s22  ;;  %p2946_p13 = scmp.lt.u32.totalorder %s2942_s22, %s3738_s8 }
  0x5b   :  { %p2948_p0 = pnand %p2946_p13, %p2943_p12 }
  0x5d   :  { %2951 = shalt.err (!%p2948_p0)
}
  0x5e   :  { %s2952_s27 = scalar_lea.vmem %s3185_s18, 32  ;;  %p2957_p2 = scmp.lt.s32.totalorder %s3185_s18, %s3185_s18 }
  0x5f   :  { %p2953_p1 = scmp.ne.s32.totalorder %s3185_s18, %s2952_s27  ;;  %p2958_p3 = scmp.lt.s32.totalorder %s2952_s27, %s2952_s27 }
  0x61   :  { %p2959_p4 = por %p2958_p3, %p2957_p2 }
  0x63   :  { %p2960_p5 = pnand %p2959_p4, %p2953_p1 }
  0x65   :  { %2963 = shalt.err (!%p2960_p5)
}
  0x66   :  { %90 = dma.hbm_to_vmem [thread:$0]  %s3738_s8, 32, %s3185_s18, [#allocation9], %s3024_s21, %s3024_s21, %s3025_s3  }
  0x67   :  { %s3028_s28 = smov [#allocation13]   ;;  %s2964_s17 = scalar_lea.hbm %s3742_s12, 32 }
  0x68   :  { %s112_s1 = sshll.u32 %s3028_s28, 4  ;;  %p2965_p6 = scmp.ne.s32.totalorder %s3742_s12, %s2964_s17  ;;  %s113_s1 = int_to_ptr.vmem [resolvable:$true] %s112_s1 }
  0x69   :  { %p2968_p7 = scmp.lt.u32.totalorder %s2964_s17, %s3742_s12 }
  0x6b   :  { %p2970_p8 = pnand %p2968_p7, %p2965_p6 }
  0x6d   :  { %2973 = shalt.err (!%p2970_p8)
}
  0x6e   :  { %s2974_s24 = scalar_lea.vmem %s113_s1, 32  ;;  %p2979_p10 = scmp.lt.s32.totalorder %s113_s1, %s113_s1 }
  0x6f   :  { %p2975_p9 = scmp.ne.s32.totalorder %s113_s1, %s2974_s24  ;;  %p2980_p11 = scmp.lt.s32.totalorder %s2974_s24, %s2974_s24 }
  0x71   :  { %p2981_p12 = por %p2980_p11, %p2979_p10 }
  0x73   :  { %p2982_p13 = pnand %p2981_p12, %p2975_p9 }
  0x75   :  { %2985 = shalt.err (!%p2982_p13)
}
  0x76   :  { %118 = dma.hbm_to_vmem [thread:$0]  %s3742_s12, 32, %s113_s1, [#allocation12], %s3024_s21, %s3024_s21, %s3025_s3  }
  0x77   :  { %3008 = dma.done.wait [#allocation3], 256  }
  0x78   :  { %3009 = vsyncadd [#allocation3], 4294967040 }
  0x79   :  { %3010 = dma.done.wait [#allocation6], 528  }
  0x7a   :  { %3011 = vsyncadd [#allocation6], 4294966768 }
  0x7b   :  { %3012 = dma.done.wait [#allocation9], 544  }
  0x7c   :  { %3013 = vsyncadd [#allocation9], 4294966752 }
  0x7d   :  { %3014 = dma.done.wait [#allocation12], 64  }
  0x7e   :  { %3015 = vsyncadd [#allocation12], 4294967232  ;;  %v3029_v0 = vmov 0   ;;  %v459_v1 = vld [vmem:[%s3736_s6 + $0x10] sm:$0xff]  ;;  %v457_v2 = vld [vmem:[%s3736_s6] sm:$0xff]  ;;  %vm162_vm0 = vcmask 130048  }
  0x7f   :  { %2823 = vset.pattern.permute.xlu1 %v3029_v0  ;;  %2822 = vset.pattern.permute.xlu0 %v3029_v0  ;;  %v460_v3 = vld [vmem:[%s3736_s6 + $0x18] sm:$0xff]  ;;  %v458_v4 = vld [vmem:[%s3736_s6 + $0x8] sm:$0xff]  ;;  %v153_v5 = vld [vmem:[#allocation2] sm:$0xff]  ;;  %vm537_vm1 = vcmask 523264   ;;  %vm311_vm2 = vcmask 261120  }
  0x80   :  { %477 = vperm.xlu1 %2823, %v459_v1   ;;  %467 = vperm.xlu0 %2822, %v457_v2   ;;  %v154_v6 = vld [vmem:[#allocation2 + $0x8] sm:$0xff]  ;;  %v461_v8 = vld [vmem:[%s3736_s6 + $0x20] sm:$0xff]  ;;  %v464_v11 = vld [vmem:[%s3736_s6 + $0x38] sm:$0xff] }
  0x81   :  { %v462_v7 = vld [vmem:[%s3736_s6 + $0x28] sm:$0xff]  ;;  %v2741_v9 = vpack.c.bf16 %v154_v6, %v153_v5  ;;  %v3255_v10 = vld [vmem:[%s3730_s0] sm:$0xff]  ;;  %v463_v12 = vld [vmem:[%s3736_s6 + $0x30] sm:$0xff] }
  0x82   :  { %2493 = vmatprep.mubr.msk.f32.mxu0 %vm162_vm0, %v3255_v10  ;;  %v3268_v13 = vld [vmem:[%s3730_s0 + $0x8] sm:$0xff]  ;;  %v2274_v15 = vld [vmem:[%s3736_s6 + $0x40] sm:$0xff]  ;;  %v3281_v16 = vld [vmem:[%s3730_s0 + $0x10] sm:$0xff] }
  0x83   :  { %2742 = vmatprep.subr.bf16.mxu0 %v2741_v9  ;;  %v2275_v14 = vld [vmem:[%s3736_s6 + $0x48] sm:$0xff]  ;;  %v3288_v17 = vld [vmem:[%s3730_s0 + $0x18] sm:$0xff]  ;;  %v2276_v19 = vld [vmem:[%s3736_s6 + $0x50] sm:$0xff] }
  0x84   :  { %482 = vperm.xlu1 %2823, %v460_v3   ;;  %472 = vperm.xlu0 %2822, %v458_v4   ;;  %v2277_v18 = vld [vmem:[%s3736_s6 + $0x58] sm:$0xff]  ;;  %v3301_v20 = vld [vmem:[%s3730_s0 + $0x20] sm:$0xff]  ;;  %v3308_v21 = vld [vmem:[%s3730_s0 + $0x28] sm:$0xff] }
  0x85   :  { %2744 = vmatpush3.bf16.msra.mxu0 %v2741_v9  ;;  %v2279_v22 = vld [vmem:[%s3736_s6 + $0x68] sm:$0xff]  ;;  %v2278_v23 = vld [vmem:[%s3736_s6 + $0x60] sm:$0xff]  ;;  %v3321_v24 = vld [vmem:[%s3730_s0 + $0x30] sm:$0xff] }
  0x86   :  { %v2824_v25 = vld [vmem:[%s3735_s5] sm:$0xff]   ;;  %v3331_v26 = vld [vmem:[%s3730_s0 + $0x38] sm:$0xff]  ;;  %v2280_v28 = vld [vmem:[%s3736_s6 + $0x70] sm:$0xff] }
  0x87   :  { %v2281_v27 = vld [vmem:[%s3736_s6 + $0x78] sm:$0xff]  ;;  %v300_v29 = vld [vmem:[#allocation5] sm:$0xff]  ;;  %v302_v32 = vld [vmem:[#allocation5 + $0x10] sm:$0xff] }
  0x88   :  { %492 = vperm.xlu1 %2823, %v462_v7   ;;  %487 = vperm.xlu0 %2822, %v461_v8   ;;  %v301_v30 = vld [vmem:[#allocation5 + $0x8] sm:$0xff]  ;;  %v303_v33 = vld [vmem:[#allocation5 + $0x18] sm:$0xff]  ;;  %v3382_v59 = vld [vmem:[%s3735_s5 + $0x10] sm:$0xff]  }
  0x89   :  { %2494 = vmatmul.mubr.msk.f32.vlgmr.msra.gmra.mrb[0].mxu0 %vm162_vm0, %v3268_v13  ;;  %v2745_v31 = vpack.c.bf16 %v301_v30, %v300_v29  ;;  %v2749_v34 = vpack.c.bf16 %v303_v33, %v302_v32  ;;  %v623_v35 = vld [vmem:[#allocation8] sm:$0xff]  ;;  %v624_v36 = vld [vmem:[#allocation8 + $0x8] sm:$0xff]  ;;  %v3377_v58 = vld [vmem:[%s3735_s5 + $0x8] sm:$0xff]  }
  0x8a   :  { %2496 = vmatprep.mubr.msk.f32.mxu0 %vm162_vm0, %v3281_v16  ;;  %v2753_v37 = vpack.c.bf16 %v624_v36, %v623_v35  ;;  %v3391_v60 = vld [vmem:[%s3735_s5 + $0x18] sm:$0xff]   ;;  %v2200_v61 = vld [vmem:[%s3732_s2] ss:$0 sm:$0xff] }
  0x8b   :  { %2746 = vmatprep.subr.bf16.mxu1 %v2745_v31 }
  0x8c   :  { %502 = vperm.xlu1 %2823, %v464_v11   ;;  %497 = vperm.xlu0 %2822, %v463_v12  }
  0x8d   :  { %2497 = vmatmul.mubr.msk.f32.gmra.mrb[2].mxu0 %vm162_vm0, %v3288_v17  ;;  %2748 = vmatpush3.bf16.msra.mxu1 %v2745_v31 }
  0x8e   :  { %2499 = vmatprep.mubr.msk.f32.mxu0 %vm162_vm0, %v3301_v20  ;;  %2750 = vmatprep.subr.bf16.mxu1 %v2749_v34 }
  0x90   :  { %1331 = vperm.xlu1 %2823, %v2275_v14   ;;  %1326 = vperm.xlu0 %2822, %v2274_v15  }
  0x91   :  { %2500 = vmatmul.mubr.msk.f32.gmra.mrb[4].mxu0 %vm162_vm0, %v3308_v21  ;;  %2752 = vmatpush3.bf16.msra.mxu1 %v2749_v34 }
  0x92   :  { %2502 = vmatprep.mubr.msk.f32.mxu0 %vm162_vm0, %v3321_v24  ;;  %2754 = vmatprep.subr.bf16.mxu1 %v2753_v37 }
  0x94   :  { %1341 = vperm.xlu1 %2823, %v2277_v18   ;;  %1336 = vperm.xlu0 %2822, %v2276_v19  }
  0x95   :  { %2503 = vmatmul.mubr.msk.f32.gmra.mrb[6].mxu0 %vm162_vm0, %v3331_v26 }
  0x96   :  { %2533 = vmatprep.mubr.msk.bf16.mxu0 %vm537_vm1, %v2824_v25 }
  0x98   :  { %1351 = vperm.xlu1 %2823, %v2279_v22   ;;  %1346 = vperm.xlu0 %2822, %v2278_v23  }
  0x9c   :  { %1361 = vperm.xlu1 %2823, %v2281_v27   ;;  %1356 = vperm.xlu0 %2822, %v2280_v28  }
  0xff   :  { %v3342_v38 = vpop.permute.xlu1 %477  ;;  %v3344_v39 = vpop.permute.xlu0 %467 }
 0x100   :  { %v505_v42 = vmul.f32 %v3344_v39, %v3255_v10  ;;  %v507_v44 = vmul.f32 %v3342_v38, %v3281_v16 }
 0x103   :  { %v3346_v40 = vpop.permute.xlu1 %482  ;;  %v3348_v41 = vpop.permute.xlu0 %472 }
 0x104   :  { %v506_v43 = vmul.f32 %v3348_v41, %v3268_v13  ;;  %v508_v45 = vmul.f32 %v3346_v40, %v3288_v17 }
 0x106   :  { %v513_v46 = vpack.c.bf16 %v506_v43, %v505_v42  ;;  %v514_v49 = vpack.c.bf16 %v508_v45, %v507_v44 }
 0x107   :  { %v3358_v47 = vpop.permute.xlu1 %492  ;;  %v3360_v48 = vpop.permute.xlu0 %487 }
 0x108   :  { %2525 = vmatprep.subr.bf16.mxu0 %v513_v46  ;;  %v509_v50 = vmul.f32 %v3360_v48, %v3301_v20  ;;  %v510_v51 = vmul.f32 %v3358_v47, %v3308_v21 }
 0x109   :  { %2526 = vmatpush3.bf16.msra.mxu0 %v513_v46 }
 0x10a   :  { %2527 = vmatprep.subr.bf16.mxu0 %v514_v49  ;;  %v515_v54 = vpack.c.bf16 %v510_v51, %v509_v50 }
 0x10b   :  { %v3366_v52 = vpop.permute.xlu1 %502  ;;  %v3368_v53 = vpop.permute.xlu0 %497 }
 0x10c   :  { %v511_v55 = vmul.f32 %v3368_v53, %v3321_v24  ;;  %v512_v56 = vmul.f32 %v3366_v52, %v3331_v26 }
 0x10d   :  { %2528 = vmatpush3.bf16.msra.mxu0 %v514_v49 }
 0x10e   :  { %2529 = vmatprep.subr.bf16.mxu0 %v515_v54  ;;  %v516_v57 = vpack.c.bf16 %v512_v56, %v511_v55 }
 0x111   :  { %2530 = vmatpush3.bf16.msra.mxu0 %v515_v54 }
 0x112   :  { %2531 = vmatprep.subr.bf16.mxu0 %v516_v57 }
 0x115   :  { %2532 = vmatpush3.bf16.msra.mxu0 %v516_v57 }
 0x118   :  { %2534 = vmatmul.mubr.msk.bf16.vlgmr.msra.gmra.mrb[8].mxu0 %vm537_vm1, %v3377_v58 }
 0x119   :  { %2537 = vmatprep.mubr.msk.bf16.mxu0 %vm537_vm1, %v3382_v59 }
 0x120   :  { %2538 = vmatmul.mubr.msk.bf16.gmra.mrb[12].mxu0 %vm537_vm1, %v3391_v60 }
 0x121   :  { %2565 = vmatprep.mubr.msk.bf16.mxu0 %vm537_vm1, %v2824_v25 }
 0x15c   :  { %v2495_v62 = vpop.f32.mrb[0].mxu0 }
 0x15d   :  { %v259_v63 = vadd.f32 %v2495_v62, %v2200_v61  ;;  %v253_v0 = vpop.f32.mrb[1].mxu0 }
 0x15e   :  { %v254_v1 = vadd.f32 %v2200_v61, %v253_v0 }
 0x15f   :  { %v293_v2 = vmax.f32 %v259_v63, 0.0 }
 0x160   :  { %v292_v3 = vmax.f32 %v254_v1, 0.0  ;;  %v2498_v4 = vpop.f32.mrb[2].mxu0  ;;  %v854_v1 = vld [vmem:[%s3739_s9] sm:$0xff] }
 0x161   :  { %v269_v5 = vadd.f32 %v2498_v4, %v2200_v61  ;;  %v263_v6 = vpop.f32.mrb[3].mxu0 }
 0x162   :  { %v264_v7 = vadd.f32 %v2200_v61, %v263_v6  ;;  %2513 = vmatprep.mubr.msk.f32.mxu1 %vm311_vm2, %v292_v3  ;;  %v856_v3 = vld [vmem:[%s3739_s9 + $0x10] sm:$0xff] }
 0x163   :  { %v295_v8 = vmax.f32 %v269_v5, 0.0  ;;  %2514 = vmatmul.mubr.msk.f32.vlgmr.msra.gmra.mrb[0].mxu1 %vm311_vm2, %v293_v2  ;;  %v855_v2 = vld [vmem:[%s3739_s9 + $0x8] sm:$0xff]  ;;  %v857_v5 = vld [vmem:[%s3739_s9 + $0x18] sm:$0xff] }
 0x164   :  { %v294_v9 = vmax.f32 %v264_v7, 0.0  ;;  %v2501_v11 = vpop.f32.mrb[4].mxu0  ;;  %2756 = vmatpush3.bf16.msra.mxu1 %v2753_v37  ;;  %v2757_v4 = vpack.c.bf16 %v855_v2, %v854_v1  ;;  %v2761_v6 = vpack.c.bf16 %v857_v5, %v856_v3  ;;  %v2226_v7 = vld [vmem:[#allocation10] ss:$0 sm:$0xff]  ;;  %v1002_v5 = vld [vmem:[%s3741_s11] sm:$0xff] }
 0x165   :  { %v279_v12 = vadd.f32 %v2501_v11, %v2200_v61  ;;  %v273_v14 = vpop.f32.mrb[5].mxu0 }
 0x166   :  { %v274_v15 = vadd.f32 %v2200_v61, %v273_v14  ;;  %2516 = vmatprep.mubr.msk.f32.mxu1 %vm311_vm2, %v294_v9  ;;  %2758 = vmatprep.subr.bf16.mxu1 %v2757_v4 }
 0x167   :  { %v297_v18 = vmax.f32 %v279_v12, 0.0  ;;  %2517 = vmatmul.mubr.msk.f32.gmra.mrb[2].mxu1 %vm311_vm2, %v295_v8 }
 0x168   :  { %v296_v19 = vmax.f32 %v274_v15, 0.0  ;;  %v2504_v22 = vpop.f32.mrb[6].mxu0 }
 0x169   :  { %v289_v23 = vadd.f32 %v2504_v22, %v2200_v61  ;;  %v283_v25 = vpop.f32.mrb[7].mxu0 }
 0x16a   :  { %v284_v27 = vadd.f32 %v2200_v61, %v283_v25  ;;  %2519 = vmatprep.mubr.msk.f32.mxu1 %vm311_vm2, %v296_v19 }
 0x16b   :  { %v299_v28 = vmax.f32 %v289_v23, 0.0  ;;  %2520 = vmatmul.mubr.msk.f32.gmra.mrb[4].mxu1 %vm311_vm2, %v297_v18 }
 0x16c   :  { %v298_v29 = vmax.f32 %v284_v27, 0.0 }
 0x16e   :  { %2522 = vmatprep.mubr.msk.f32.mxu1 %vm311_vm2, %v298_v29 }
 0x16f   :  { %2523 = vmatmul.mubr.msk.f32.gmra.mrb[6].mxu1 %vm311_vm2, %v299_v28 }
 0x1eb   :  { %v2535_v30 = vpop.f32.mrb[8].mxu0 }
 0x1ec   :  { %v584_v31 = vpop.f32.mrb[9].mxu0  ;;  %v617_v36 = vmul.f32 %v2535_v30, %v3342_v38 }
 0x1ed   :  { %v615_v32 = vmul.f32 %v584_v31, %v3344_v39  ;;  %v2536_v33 = vpop.f32.mrb[10].mxu0 }
 0x1ee   :  { %v587_v34 = vpop.f32.mrb[11].mxu0  ;;  %v618_v37 = vmul.f32 %v2536_v33, %v3346_v40 }
 0x1ef   :  { %v616_v35 = vmul.f32 %v587_v34, %v3348_v41  ;;  %2545 = vmatprep.mubr.msk.f32.mxu1 %vm162_vm0, %v615_v32 }
 0x1f1   :  { %2546 = vmatmul.mubr.msk.f32.vlgmr.msra.gmra.mrb[8].mxu1 %vm162_vm0, %v616_v35 }
 0x1f2   :  { %2548 = vmatprep.mubr.msk.f32.mxu1 %vm162_vm0, %v617_v36  ;;  %2760 = vmatpush3.bf16.msra.mxu1 %v2757_v4 }
 0x1f3   :  { %v2539_v42 = vpop.f32.mrb[12].mxu0  ;;  %2762 = vmatprep.subr.bf16.mxu1 %v2761_v6 }
 0x1f4   :  { %v600_v43 = vpop.f32.mrb[13].mxu0  ;;  %v621_v50 = vmul.f32 %v2539_v42, %v3368_v53 }
 0x1f5   :  { %v619_v44 = vmul.f32 %v600_v43, %v3360_v48  ;;  %v2540_v45 = vpop.f32.mrb[14].mxu0  ;;  %2549 = vmatmul.mubr.msk.f32.gmra.mrb[10].mxu1 %vm162_vm0, %v618_v37 }
 0x1f6   :  { %v603_v46 = vpop.f32.mrb[15].mxu0  ;;  %v622_v51 = vmul.f32 %v2540_v45, %v3366_v52  ;;  %2764 = vmatpush3.bf16.msra.mxu1 %v2761_v6  ;;  %v1003_v6 = vld [vmem:[%s3741_s11 + $0x8] sm:$0xff] }
 0x1f7   :  { %v620_v49 = vmul.f32 %v603_v46, %v3358_v47  ;;  %2551 = vmatprep.mubr.msk.f32.mxu1 %vm162_vm0, %v619_v44 }
 0x1f9   :  { %2552 = vmatmul.mubr.msk.f32.gmra.mrb[12].mxu1 %vm162_vm0, %v620_v49 }
 0x1fa   :  { %2554 = vmatprep.mubr.msk.f32.mxu1 %vm162_vm0, %v621_v50 }
 0x1fd   :  { %2555 = vmatmul.mubr.msk.f32.gmra.mrb[14].mxu1 %vm162_vm0, %v622_v51 }
 0x236   :  { %v3423_v54 = vpop.f32.mrb[0].mxu1 }
 0x237   :  { %v3425_v55 = vpop.f32.mrb[1].mxu1 }
 0x23a   :  { %v3427_v56 = vpop.f32.mrb[2].mxu1 }
 0x23b   :  { %v3429_v57 = vpop.f32.mrb[3].mxu1 }
 0x23e   :  { %v3431_v61 = vpop.f32.mrb[4].mxu1 }
 0x23f   :  { %v3433_v62 = vpop.f32.mrb[5].mxu1 }
 0x242   :  { %v3435_v63 = vpop.f32.mrb[6].mxu1 }
 0x243   :  { %v3437_v0 = vpop.f32.mrb[7].mxu1 }
 0x2c4   :  { %v2547_v8 = vpop.f32.mrb[8].mxu1 }
 0x2c5   :  { %v728_v9 = vadd.f32 %v2547_v8, %v2226_v7  ;;  %v722_v11 = vpop.f32.mrb[9].mxu1 }
 0x2c6   :  { %v723_v12 = vadd.f32 %v2226_v7, %v722_v11  ;;  %v1004_v11 = vld [vmem:[%s3741_s11 + $0x10] sm:$0xff] }
 0x2c7   :  { %v762_v14 = vmax.f32 %v728_v9, 0.0  ;;  %v2765_v9 = vpack.c.bf16 %v1003_v6, %v1002_v5 }
 0x2c8   :  { %v761_v15 = vmax.f32 %v723_v12, 0.0  ;;  %v2550_v18 = vpop.f32.mrb[10].mxu1  ;;  %v1005_v12 = vld [vmem:[%s3741_s11 + $0x18] sm:$0xff] }
 0x2c9   :  { %v770_v19 = vmul.f32 %v762_v14, %v3348_v41  ;;  %v738_v22 = vadd.f32 %v2550_v18, %v2226_v7  ;;  %v732_v23 = vpop.f32.mrb[11].mxu1  ;;  %v3471_v14 = vpop.permute.xlu1 %1331  ;;  %v2769_v18 = vpack.c.bf16 %v1005_v12, %v1004_v11 }
 0x2ca   :  { %v769_v25 = vmul.f32 %v761_v15, %v3344_v39  ;;  %v733_v27 = vadd.f32 %v2226_v7, %v732_v23  ;;  %v3473_v15 = vpop.permute.xlu0 %1326 }
 0x2cb   :  { %v764_v28 = vmax.f32 %v738_v22, 0.0  ;;  %v1364_v22 = vmul.f32 %v3473_v15, %v3255_v10 }
 0x2cc   :  { %v763_v29 = vmax.f32 %v733_v27, 0.0  ;;  %v2553_v30 = vpop.f32.mrb[12].mxu1  ;;  %v777_v31 = vpack.c.bf16 %v770_v19, %v769_v25  ;;  %v1365_v19 = vmul.f32 %v3471_v14, %v3268_v13 }
 0x2cd   :  { %v772_v32 = vmul.f32 %v764_v28, %v3346_v40  ;;  %v748_v33 = vadd.f32 %v2553_v30, %v2226_v7  ;;  %v742_v34 = vpop.f32.mrb[13].mxu1 }
 0x2ce   :  { %v771_v35 = vmul.f32 %v763_v29, %v3342_v38  ;;  %v743_v36 = vadd.f32 %v2226_v7, %v742_v34  ;;  %2557 = vmatprep.subr.bf16.mxu0 %v777_v31  ;;  %v1372_v23 = vpack.c.bf16 %v1365_v19, %v1364_v22  ;;  %v1153_v34 = vld [vmem:[%s3743_s13 + $0x18] sm:$0xff] }
 0x2cf   :  { %v766_v37 = vmax.f32 %v748_v33, 0.0  ;;  %2558 = vmatpush3.bf16.msra.mxu0 %v777_v31 }
 0x2d0   :  { %v765_v42 = vmax.f32 %v743_v36, 0.0  ;;  %v2556_v43 = vpop.f32.mrb[14].mxu1  ;;  %v778_v44 = vpack.c.bf16 %v772_v32, %v771_v35  ;;  %v3513_v35 = vpop.permute.xlu1 %1341 }
 0x2d1   :  { %v774_v45 = vmul.f32 %v766_v37, %v3358_v47  ;;  %v758_v46 = vadd.f32 %v2556_v43, %v2226_v7  ;;  %v752_v49 = vpop.f32.mrb[15].mxu1  ;;  %v3515_v36 = vpop.permute.xlu0 %1336  ;;  %v2239_v37 = vld [vmem:[#allocation11] ss:$0 sm:$0xff] }
 0x2d2   :  { %v773_v50 = vmul.f32 %v765_v42, %v3360_v48  ;;  %v753_v51 = vadd.f32 %v2226_v7, %v752_v49  ;;  %2559 = vmatprep.subr.bf16.mxu0 %v778_v44 }
 0x2d3   :  { %v768_v1 = vmax.f32 %v758_v46, 0.0  ;;  %2560 = vmatpush3.bf16.msra.mxu0 %v778_v44 }
 0x2d4   :  { %v767_v2 = vmax.f32 %v753_v51, 0.0  ;;  %v779_v3 = vpack.c.bf16 %v774_v45, %v773_v50  ;;  %v3517_v43 = vpop.permute.xlu1 %1351  ;;  %v1367_v50 = vmul.f32 %v3513_v35, %v3288_v17  ;;  %v1366_v51 = vmul.f32 %v3515_v36, %v3281_v16 }
 0x2d5   :  { %v776_v4 = vmul.f32 %v768_v1, %v3366_v52  ;;  %v3519_v46 = vpop.permute.xlu0 %1346 }
 0x2d6   :  { %v775_v8 = vmul.f32 %v767_v2, %v3368_v53  ;;  %2561 = vmatprep.subr.bf16.mxu0 %v779_v3  ;;  %v1373_v17 = vpack.c.bf16 %v1367_v50, %v1366_v51 }
 0x2d7   :  { %2562 = vmatpush3.bf16.msra.mxu0 %v779_v3 }
 0x2d8   :  { %v780_v7 = vpack.c.bf16 %v776_v4, %v775_v8  ;;  %v1369_v8 = vmul.f32 %v3517_v43, %v3308_v21 }
 0x2d9   :  { %v3533_v16 = vpop.permute.xlu0 %1356 }
 0x2da   :  { %2563 = vmatprep.subr.bf16.mxu0 %v780_v7  ;;  %v1370_v21 = vmul.f32 %v3533_v16, %v3321_v24  ;;  %v2828_v24 = vld [vmem:[%s3735_s5 + $0x20] sm:$0xff]  }
 0x2db   :  { %2564 = vmatpush3.bf16.msra.mxu0 %v780_v7  ;;  %v1368_v7 = vmul.f32 %v3519_v46, %v3301_v20 }
 0x2dc   :  { %2766 = vmatprep.subr.bf16.mxu0 %v2765_v9 }
 0x2de   :  { %2566 = vmatmul.mubr.msk.bf16.vlgmr.msra.gmra.mrb[16].mxu0 %vm537_vm1, %v3377_v58 }
 0x2df   :  { %2768 = vmatpush3.bf16.msra.mxu0 %v2765_v9  ;;  %2569 = vmatprep.mubr.msk.bf16.mxu0 %vm537_vm1, %v3382_v59  ;;  %v3530_v9 = vpop.permute.xlu1 %1361 }
 0x2e0   :  { %2770 = vmatprep.subr.bf16.mxu0 %v2769_v18  ;;  %v1371_v20 = vmul.f32 %v3530_v9, %v3331_v26 }
 0x2e3   :  { %2772 = vmatpush3.bf16.msra.mxu0 %v2769_v18 }
 0x2e4   :  { %2633 = vmatprep.subr.bf16.mxu0 %v1372_v23 }
 0x2e6   :  { %2570 = vmatmul.mubr.msk.bf16.gmra.mrb[20].mxu0 %vm537_vm1, %v3391_v60 }
 0x3b1   :  { %v2567_v25 = vpop.f32.mrb[16].mxu0 }
 0x3b2   :  { %v815_v27 = vpop.f32.mrb[17].mxu0  ;;  %v848_v58 = vmul.f32 %v2567_v25, %v3342_v38 }
 0x3b3   :  { %v846_v13 = vmul.f32 %v815_v27, %v3344_v39  ;;  %v2568_v28 = vpop.f32.mrb[18].mxu0  ;;  %v1374_v27 = vpack.c.bf16 %v1369_v8, %v1368_v7 }
 0x3b4   :  { %v818_v10 = vpop.f32.mrb[19].mxu0  ;;  %v849_v59 = vmul.f32 %v2568_v28, %v3346_v40 }
 0x3b5   :  { %v847_v29 = vmul.f32 %v818_v10, %v3348_v41  ;;  %2581 = vmatprep.mubr.msk.f32.mxu1 %vm311_vm2, %v846_v13 }
 0x3b7   :  { %2582 = vmatmul.mubr.msk.f32.vlgmr.msra.gmra.mrb[16].mxu1 %vm311_vm2, %v847_v29 }
 0x3b8   :  { %2584 = vmatprep.mubr.msk.f32.mxu1 %vm311_vm2, %v848_v58 }
 0x3b9   :  { %v2571_v30 = vpop.f32.mrb[20].mxu0 }
 0x3ba   :  { %v831_v60 = vpop.f32.mrb[21].mxu0  ;;  %v852_v38 = vmul.f32 %v2571_v30, %v3368_v53  ;;  %v1152_v53 = vld [vmem:[%s3743_s13 + $0x10] sm:$0xff] }
 0x3bb   :  { %v850_v31 = vmul.f32 %v831_v60, %v3360_v48  ;;  %v2572_v32 = vpop.f32.mrb[22].mxu0  ;;  %2585 = vmatmul.mubr.msk.f32.gmra.mrb[18].mxu1 %vm311_vm2, %v849_v59  ;;  %v1150_v48 = vld [vmem:[%s3743_s13] sm:$0xff]  ;;  %v1375_v59 = vpack.c.bf16 %v1371_v20, %v1370_v21  ;;  %v3551_v60 = vld [vmem:[%s3735_s5 + $0x28] sm:$0xff]  }
 0x3bc   :  { %v834_v39 = vpop.f32.mrb[23].mxu0  ;;  %v853_v40 = vmul.f32 %v2572_v32, %v3366_v52  ;;  %v2777_v52 = vpack.c.bf16 %v1153_v34, %v1152_v53  ;;  %v3566_v32 = vld [vmem:[%s3735_s5 + $0x38] sm:$0xff]  }
 0x3bd   :  { %v851_v41 = vmul.f32 %v834_v39, %v3358_v47  ;;  %2587 = vmatprep.mubr.msk.f32.mxu1 %vm311_vm2, %v850_v31  ;;  %v1151_v47 = vld [vmem:[%s3743_s13 + $0x8] sm:$0xff]  ;;  %v3557_v31 = vld [vmem:[%s3735_s5 + $0x30] sm:$0xff]  }
 0x3be   :  { %v2773_v33 = vpack.c.bf16 %v1151_v47, %v1150_v48  ;;  %v1482_v39 = vld [vmem:[#allocation8 + $0x10] sm:$0xff] }
 0x3bf   :  { %2588 = vmatmul.mubr.msk.f32.gmra.mrb[20].mxu1 %vm311_vm2, %v851_v41  ;;  %v1483_v41 = vld [vmem:[#allocation8 + $0x18] sm:$0xff] }
 0x3c0   :  { %2590 = vmatprep.mubr.msk.f32.mxu1 %vm311_vm2, %v852_v38  ;;  %2774 = vmatprep.subr.bf16.mxu1 %v2773_v33  ;;  %v2781_v38 = vpack.c.bf16 %v1483_v41, %v1482_v39  ;;  %v2304_v39 = vld [vmem:[%s3739_s9 + $0x28] sm:$0xff]  ;;  %v2305_v41 = vld [vmem:[%s3739_s9 + $0x30] sm:$0xff] }
 0x3c1   :  { %2776 = vmatpush3.bf16.msra.mxu1 %v2773_v33 }
 0x3c2   :  { %2778 = vmatprep.subr.bf16.mxu1 %v2777_v52 }
 0x3c3   :  { %2591 = vmatmul.mubr.msk.f32.gmra.mrb[22].mxu1 %vm311_vm2, %v853_v40  ;;  %v2248_v40 = vld [vmem:[#allocation13] ss:$0 sm:$0xff] }
 0x3c5   :  { %2780 = vmatpush3.bf16.msra.mxu1 %v2777_v52 }
 0x3c6   :  { %2782 = vmatprep.subr.bf16.mxu1 %v2781_v38 }
 0x48a   :  { %v2583_v42 = vpop.f32.mrb[16].mxu1 }
 0x48b   :  { %v961_v44 = vadd.f32 %v2583_v42, %v2239_v37  ;;  %v955_v45 = vpop.f32.mrb[17].mxu1 }
 0x48c   :  { %v956_v49 = vadd.f32 %v2239_v37, %v955_v45 }
 0x48d   :  { %v995_v3 = vmax.f32 %v961_v44, 0.0 }
 0x48e   :  { %v994_v1 = vmax.f32 %v956_v49, 0.0  ;;  %v2586_v2 = vpop.f32.mrb[18].mxu1 }
 0x48f   :  { %v971_v4 = vadd.f32 %v2586_v2, %v2239_v37  ;;  %v965_v5 = vpop.f32.mrb[19].mxu1 }
 0x490   :  { %v966_v6 = vadd.f32 %v2239_v37, %v965_v5  ;;  %2601 = vmatprep.mubr.msk.f32.mxu0 %vm311_vm2, %v994_v1 }
 0x491   :  { %2602 = vmatmul.mubr.msk.f32.vlgmr.msra.gmra.mrb[24].mxu0 %vm311_vm2, %v995_v3  ;;  %v997_v18 = vmax.f32 %v971_v4, 0.0 }
 0x492   :  { %v996_v11 = vmax.f32 %v966_v6, 0.0  ;;  %2634 = vmatpush3.bf16.msra.mxu0 %v1372_v23  ;;  %v2589_v12 = vpop.f32.mrb[20].mxu1 }
 0x493   :  { %v981_v19 = vadd.f32 %v2589_v12, %v2239_v37  ;;  %2635 = vmatprep.subr.bf16.mxu0 %v1373_v17  ;;  %v975_v22 = vpop.f32.mrb[21].mxu1 }
 0x494   :  { %v976_v25 = vadd.f32 %v2239_v37, %v975_v22  ;;  %2604 = vmatprep.mubr.msk.f32.mxu0 %vm311_vm2, %v996_v11 }
 0x495   :  { %2605 = vmatmul.mubr.msk.f32.gmra.mrb[26].mxu0 %vm311_vm2, %v997_v18  ;;  %v999_v28 = vmax.f32 %v981_v19, 0.0 }
 0x496   :  { %v998_v13 = vmax.f32 %v976_v25, 0.0  ;;  %2636 = vmatpush3.bf16.msra.mxu0 %v1373_v17  ;;  %v2592_v23 = vpop.f32.mrb[22].mxu1 }
 0x497   :  { %v991_v10 = vadd.f32 %v2592_v23, %v2239_v37  ;;  %2637 = vmatprep.subr.bf16.mxu0 %v1374_v27  ;;  %v985_v29 = vpop.f32.mrb[23].mxu1 }
 0x498   :  { %v986_v58 = vadd.f32 %v2239_v37, %v985_v29  ;;  %2607 = vmatprep.mubr.msk.f32.mxu0 %vm311_vm2, %v998_v13 }
 0x499   :  { %2608 = vmatmul.mubr.msk.f32.gmra.mrb[28].mxu0 %vm311_vm2, %v999_v28  ;;  %v1001_v30 = vmax.f32 %v991_v10, 0.0 }
 0x49a   :  { %v1000_v26 = vmax.f32 %v986_v58, 0.0  ;;  %2638 = vmatpush3.bf16.msra.mxu0 %v1374_v27 }
 0x49b   :  { %2639 = vmatprep.subr.bf16.mxu0 %v1375_v59 }
 0x49c   :  { %2610 = vmatprep.mubr.msk.f32.mxu0 %vm311_vm2, %v1000_v26 }
 0x49d   :  { %2611 = vmatmul.mubr.msk.f32.gmra.mrb[30].mxu0 %vm311_vm2, %v1001_v30  ;;  %v2303_v30 = vld [vmem:[%s3739_s9 + $0x20] sm:$0xff] }
 0x49e   :  { %2640 = vmatpush3.bf16.msra.mxu0 %v1375_v59  ;;  %2641 = vmatprep.mubr.msk.bf16.mxu0 %vm537_vm1, %v2828_v24 }
 0x4a1   :  { %2642 = vmatmul.mubr.msk.bf16.vlgmr.msra.gmra.mrb[32].mxu0 %vm537_vm1, %v3551_v60 }
 0x4a2   :  { %2645 = vmatprep.mubr.msk.bf16.mxu0 %vm537_vm1, %v3557_v31 }
 0x4a9   :  { %2646 = vmatmul.mubr.msk.bf16.gmra.mrb[36].mxu0 %vm537_vm1, %v3566_v32 }
 0x4aa   :  { %2673 = vmatprep.mubr.msk.bf16.mxu0 %vm537_vm1, %v2828_v24 }
 0x564   :  { %v2603_v48 = vpop.f32.mrb[24].mxu0 }
 0x565   :  { %v1109_v47 = vadd.f32 %v2603_v48, %v2248_v40  ;;  %v1103_v53 = vpop.f32.mrb[25].mxu0 }
 0x566   :  { %v1104_v33 = vadd.f32 %v2248_v40, %v1103_v53  ;;  %v2257_v53 = vld [vmem:[%s3744_s14] ss:$0 sm:$0xff] }
 0x567   :  { %v1143_v37 = vmax.f32 %v1109_v47, 0.0  ;;  %v2209_v47 = vld [vmem:[#allocation7] ss:$0 sm:$0xff] }
 0x568   :  { %v1142_v34 = vmax.f32 %v1104_v33, 0.0  ;;  %v2606_v52 = vpop.f32.mrb[26].mxu0  ;;  %v408_v33 = vadd.f32 %v3423_v54, %v2209_v47 }
 0x569   :  { %v1119_v42 = vadd.f32 %v2606_v52, %v2248_v40  ;;  %v1113_v44 = vpop.f32.mrb[27].mxu0 }
 0x56a   :  { %v1114_v45 = vadd.f32 %v2248_v40, %v1113_v44  ;;  %2621 = vmatprep.mubr.msk.f32.mxu1 %vm311_vm2, %v1142_v34  ;;  %v403_v34 = vadd.f32 %v2209_v47, %v3425_v55 }
 0x56b   :  { %2622 = vmatmul.mubr.msk.f32.vlgmr.msra.gmra.mrb[24].mxu1 %vm311_vm2, %v1143_v37  ;;  %v1145_v51 = vmax.f32 %v1119_v42, 0.0 }
 0x56c   :  { %v1144_v49 = vmax.f32 %v1114_v45, 0.0  ;;  %v2609_v50 = vpop.f32.mrb[28].mxu0  ;;  %2784 = vmatpush3.bf16.msra.mxu1 %v2781_v38  ;;  %v2785_v38 = vpack.c.bf16 %v2304_v39, %v2303_v30  ;;  %v442_v45 = vmax.f32 %v408_v33, 0.0 }
 0x56d   :  { %v1129_v1 = vadd.f32 %v2609_v50, %v2248_v40  ;;  %v1123_v2 = vpop.f32.mrb[29].mxu0 }
 0x56e   :  { %v1124_v3 = vadd.f32 %v2248_v40, %v1123_v2  ;;  %2624 = vmatprep.mubr.msk.f32.mxu1 %vm311_vm2, %v1144_v49  ;;  %2786 = vmatprep.subr.bf16.mxu1 %v2785_v38  ;;  %v418_v49 = vadd.f32 %v3427_v56, %v2209_v47  ;;  %v423_v56 = vadd.f32 %v2209_v47, %v3433_v62 }
 0x56f   :  { %2625 = vmatmul.mubr.msk.f32.gmra.mrb[26].mxu1 %vm311_vm2, %v1145_v51  ;;  %v1147_v6 = vmax.f32 %v1129_v1, 0.0  ;;  %v441_v51 = vmax.f32 %v403_v34, 0.0  ;;  %v413_v1 = vadd.f32 %v2209_v47, %v3429_v57 }
 0x570   :  { %v1146_v4 = vmax.f32 %v1124_v3, 0.0  ;;  %v2612_v5 = vpop.f32.mrb[30].mxu0 }
 0x571   :  { %v1139_v8 = vadd.f32 %v2612_v5, %v2248_v40  ;;  %v1133_v7 = vpop.f32.mrb[31].mxu0 }
 0x572   :  { %v1134_v17 = vadd.f32 %v2248_v40, %v1133_v7  ;;  %2627 = vmatprep.mubr.msk.f32.mxu1 %vm311_vm2, %v1146_v4  ;;  %v2306_v40 = vld [vmem:[%s3739_s9 + $0x38] sm:$0xff]  ;;  %v428_v7 = vadd.f32 %v3431_v61, %v2209_v47  ;;  %v433_v61 = vadd.f32 %v2209_v47, %v3437_v0 }
 0x573   :  { %2628 = vmatmul.mubr.msk.f32.gmra.mrb[28].mxu1 %vm311_vm2, %v1147_v6  ;;  %v1149_v18 = vmax.f32 %v1139_v8, 0.0  ;;  %v2789_v48 = vpack.c.bf16 %v2306_v40, %v2305_v41  ;;  %v444_v8 = vmax.f32 %v418_v49, 0.0 }
 0x574   :  { %v1148_v11 = vmax.f32 %v1134_v17, 0.0  ;;  %v2643_v12 = vpop.f32.mrb[32].mxu0  ;;  %v447_v41 = vmax.f32 %v433_v61, 0.0 }
 0x575   :  { %v1442_v19 = vpop.f32.mrb[33].mxu0  ;;  %v1475_v27 = vmul.f32 %v2643_v12, %v3515_v36 }
 0x576   :  { %v1473_v22 = vmul.f32 %v1442_v19, %v3473_v15  ;;  %2630 = vmatprep.mubr.msk.f32.mxu1 %vm311_vm2, %v1148_v11  ;;  %v2644_v25 = vpop.f32.mrb[34].mxu0  ;;  %v443_v11 = vmax.f32 %v413_v1, 0.0 }
 0x577   :  { %2631 = vmatmul.mubr.msk.f32.gmra.mrb[30].mxu1 %vm311_vm2, %v1149_v18  ;;  %v1445_v20 = vpop.f32.mrb[35].mxu0  ;;  %v1476_v23 = vmul.f32 %v2644_v25, %v3513_v35 }
 0x578   :  { %v1474_v21 = vmul.f32 %v1445_v20, %v3471_v14  ;;  %2653 = vmatprep.mubr.msk.f32.mxu1 %vm162_vm0, %v1473_v22 }
 0x57b   :  { %2654 = vmatmul.mubr.msk.f32.vlgmr.msra.gmra.mrb[32].mxu1 %vm162_vm0, %v1474_v21  ;;  %v446_v21 = vmax.f32 %v428_v7, 0.0 }
 0x57c   :  { %v2647_v13 = vpop.f32.mrb[36].mxu0  ;;  %2656 = vmatprep.mubr.msk.f32.mxu1 %vm162_vm0, %v1475_v27  ;;  %2788 = vmatpush3.bf16.msra.mxu1 %v2785_v38  ;;  %v438_v27 = vadd.f32 %v3435_v63, %v2209_v47 }
 0x57d   :  { %v1458_v28 = vpop.f32.mrb[37].mxu0  ;;  %v1479_v26 = vmul.f32 %v2647_v13, %v3533_v16  ;;  %2790 = vmatprep.subr.bf16.mxu1 %v2789_v48 }
 0x57e   :  { %v1477_v10 = vmul.f32 %v1458_v28, %v3519_v46  ;;  %v2648_v29 = vpop.f32.mrb[38].mxu0  ;;  %v448_v30 = vmax.f32 %v438_v27, 0.0 }
 0x57f   :  { %v1461_v58 = vpop.f32.mrb[39].mxu0  ;;  %2657 = vmatmul.mubr.msk.f32.gmra.mrb[34].mxu1 %vm162_vm0, %v1476_v23  ;;  %v1480_v24 = vmul.f32 %v2648_v29, %v3530_v9  ;;  %v445_v23 = vmax.f32 %v423_v56, 0.0 }
 0x580   :  { %v1478_v59 = vmul.f32 %v1461_v58, %v3517_v43  ;;  %2659 = vmatprep.mubr.msk.f32.mxu1 %vm162_vm0, %v1477_v10  ;;  %2792 = vmatpush3.bf16.msra.mxu1 %v2789_v48 }
 0x583   :  { %2660 = vmatmul.mubr.msk.f32.gmra.mrb[36].mxu1 %vm162_vm0, %v1478_v59 }
 0x584   :  { %2662 = vmatprep.mubr.msk.f32.mxu1 %vm162_vm0, %v1479_v26 }
 0x587   :  { %2663 = vmatmul.mubr.msk.f32.gmra.mrb[38].mxu1 %vm162_vm0, %v1480_v24  ;;  %v2290_v24 = vld [vmem:[#allocation10 + $0x1] ss:$0 sm:$0xff] }
 0x63e   :  { %v2623_v52 = vpop.f32.mrb[24].mxu1 }
 0x63f   :  { %v1257_v37 = vadd.f32 %v2623_v52, %v2257_v53  ;;  %v1251_v42 = vpop.f32.mrb[25].mxu1 }
 0x640   :  { %v1252_v44 = vadd.f32 %v2257_v53, %v1251_v42 }
 0x641   :  { %v1291_v50 = vmax.f32 %v1257_v37, 0.0 }
 0x642   :  { %v1290_v2 = vmax.f32 %v1252_v44, 0.0  ;;  %v2626_v3 = vpop.f32.mrb[26].mxu1 }
 0x643   :  { %v3614_v4 = vadd.f32 %v1291_v50, %v442_v45  ;;  %v1267_v5 = vadd.f32 %v2626_v3, %v2257_v53  ;;  %v1261_v6 = vpop.f32.mrb[27].mxu1 }
 0x644   :  { %v3616_v54 = vadd.f32 %v1290_v2, %v441_v51  ;;  %v1262_v55 = vadd.f32 %v2257_v53, %v1261_v6 }
 0x645   :  { %v1293_v17 = vmax.f32 %v1267_v5, 0.0 }
 0x646   :  { %v1292_v12 = vmax.f32 %v1262_v55, 0.0  ;;  %v2629_v18 = vpop.f32.mrb[28].mxu1 }
 0x647   :  { %v3620_v19 = vadd.f32 %v1293_v17, %v444_v8  ;;  %v1277_v57 = vadd.f32 %v2629_v18, %v2257_v53  ;;  %v1271_v22 = vpop.f32.mrb[29].mxu1 }
 0x648   :  { %v3622_v25 = vadd.f32 %v1292_v12, %v443_v11  ;;  %v1272_v20 = vadd.f32 %v2257_v53, %v1271_v22 }
 0x649   :  { %v1295_v13 = vmax.f32 %v1277_v57, 0.0 }
 0x64a   :  { %v1294_v28 = vmax.f32 %v1272_v20, 0.0  ;;  %v2632_v10 = vpop.f32.mrb[30].mxu1 }
 0x64b   :  { %v3626_v29 = vadd.f32 %v1295_v13, %v446_v21  ;;  %v1287_v62 = vadd.f32 %v2632_v10, %v2257_v53  ;;  %v1281_v58 = vpop.f32.mrb[31].mxu1  ;;  %v2316_v10 = vld [vmem:[%s3741_s11 + $0x20] sm:$0xff] }
 0x64c   :  { %v3628_v59 = vadd.f32 %v1294_v28, %v445_v23  ;;  %v1282_v26 = vadd.f32 %v2257_v53, %v1281_v58  ;;  %v2318_v58 = vld [vmem:[%s3741_s11 + $0x30] sm:$0xff] }
 0x64d   :  { %v1297_v39 = vmax.f32 %v1287_v62, 0.0  ;;  %v2317_v62 = vld [vmem:[%s3741_s11 + $0x28] sm:$0xff] }
 0x64e   :  { %v1296_v38 = vmax.f32 %v1282_v26, 0.0  ;;  %v2655_v40 = vpop.f32.mrb[32].mxu1  ;;  %v2793_v26 = vpack.c.bf16 %v2317_v62, %v2316_v10 }
 0x64f   :  { %v3630_v63 = vadd.f32 %v1297_v39, %v448_v30  ;;  %v1588_v48 = vadd.f32 %v2655_v40, %v2290_v24  ;;  %v1582_v33 = vpop.f32.mrb[33].mxu1 }
 0x650   :  { %v3632_v0 = vadd.f32 %v1296_v38, %v447_v41  ;;  %v1583_v47 = vadd.f32 %v2290_v24, %v1582_v33 }
 0x651   :  { %v1622_v34 = vmax.f32 %v1588_v48, 0.0 }
 0x652   :  { %v1621_v52 = vmax.f32 %v1583_v47, 0.0  ;;  %v2658_v37 = vpop.f32.mrb[34].mxu1 }
 0x653   :  { %v1630_v42 = vmul.f32 %v1622_v34, %v3471_v14  ;;  %v1598_v44 = vadd.f32 %v2658_v37, %v2290_v24  ;;  %v1592_v53 = vpop.f32.mrb[35].mxu1 }
 0x654   :  { %v1629_v45 = vmul.f32 %v1621_v52, %v3473_v15  ;;  %v1593_v49 = vadd.f32 %v2290_v24, %v1592_v53 }
 0x655   :  { %v1624_v50 = vmax.f32 %v1598_v44, 0.0  ;;  %v2307_v44 = vld [vmem:[#allocation11 + $0x1] ss:$0 sm:$0xff] }
 0x656   :  { %v1623_v51 = vmax.f32 %v1593_v49, 0.0  ;;  %v2661_v1 = vpop.f32.mrb[36].mxu1  ;;  %v1637_v2 = vpack.c.bf16 %v1630_v42, %v1629_v45  ;;  %v2332_v42 = vld [vmem:[%s3743_s13 + $0x38] sm:$0xff] }
 0x657   :  { %v1632_v3 = vmul.f32 %v1624_v50, %v3513_v35  ;;  %v1608_v5 = vadd.f32 %v2661_v1, %v2290_v24  ;;  %v1602_v6 = vpop.f32.mrb[37].mxu1 }
 0x658   :  { %v1631_v55 = vmul.f32 %v1623_v51, %v3515_v36  ;;  %v1603_v8 = vadd.f32 %v2290_v24, %v1602_v6  ;;  %2665 = vmatprep.subr.bf16.mxu0 %v1637_v2 }
 0x659   :  { %v1626_v7 = vmax.f32 %v1608_v5, 0.0  ;;  %2666 = vmatpush3.bf16.msra.mxu0 %v1637_v2 }
 0x65a   :  { %v1625_v17 = vmax.f32 %v1603_v8, 0.0  ;;  %v2664_v11 = vpop.f32.mrb[38].mxu1  ;;  %v1638_v56 = vpack.c.bf16 %v1632_v3, %v1631_v55 }
 0x65b   :  { %v1634_v12 = vmul.f32 %v1626_v7, %v3517_v43  ;;  %v1618_v18 = vadd.f32 %v2664_v11, %v2290_v24  ;;  %v1612_v57 = vpop.f32.mrb[39].mxu1 }
 0x65c   :  { %v1633_v22 = vmul.f32 %v1625_v17, %v3519_v46  ;;  %v1613_v20 = vadd.f32 %v2290_v24, %v1612_v57  ;;  %2667 = vmatprep.subr.bf16.mxu0 %v1638_v56 }
 0x65d   :  { %v1628_v21 = vmax.f32 %v1618_v18, 0.0  ;;  %2668 = vmatpush3.bf16.msra.mxu0 %v1638_v56 }
 0x65e   :  { %v1627_v27 = vmax.f32 %v1613_v20, 0.0  ;;  %v1639_v13 = vpack.c.bf16 %v1634_v12, %v1633_v22 }
 0x65f   :  { %v1636_v23 = vmul.f32 %v1628_v21, %v3530_v9 }
 0x660   :  { %v1635_v61 = vmul.f32 %v1627_v27, %v3533_v16  ;;  %2669 = vmatprep.subr.bf16.mxu0 %v1639_v13 }
 0x661   :  { %2670 = vmatpush3.bf16.msra.mxu0 %v1639_v13 }
 0x662   :  { %v1640_v28 = vpack.c.bf16 %v1636_v23, %v1635_v61  ;;  %v2320_v23 = vld [vmem:[#allocation13 + $0x1] ss:$0 sm:$0xff] }
 0x664   :  { %2671 = vmatprep.subr.bf16.mxu0 %v1640_v28 }
 0x665   :  { %2672 = vmatpush3.bf16.msra.mxu0 %v1640_v28 }
 0x666   :  { %2794 = vmatprep.subr.bf16.mxu0 %v2793_v26 }
 0x668   :  { %2674 = vmatmul.mubr.msk.bf16.vlgmr.msra.gmra.mrb[40].mxu0 %vm537_vm1, %v3551_v60  ;;  %v2319_v60 = vld [vmem:[%s3741_s11 + $0x38] sm:$0xff] }
 0x669   :  { %2677 = vmatprep.mubr.msk.bf16.mxu0 %vm537_vm1, %v3557_v31  ;;  %v2797_v31 = vpack.c.bf16 %v2319_v60, %v2318_v58  ;;  %2796 = vmatpush3.bf16.msra.mxu0 %v2793_v26 }
 0x66b   :  { %2798 = vmatprep.subr.bf16.mxu0 %v2797_v31 }
 0x66d   :  { %2800 = vmatpush3.bf16.msra.mxu0 %v2797_v31 }
 0x670   :  { %2678 = vmatmul.mubr.msk.bf16.gmra.mrb[44].mxu0 %vm537_vm1, %v3566_v32 }
 0x73b   :  { %v2675_v32 = vpop.f32.mrb[40].mxu0 }
 0x73c   :  { %v1675_v24 = vpop.f32.mrb[41].mxu0  ;;  %v1708_v40 = vmul.f32 %v2675_v32, %v3515_v36 }
 0x73d   :  { %v1706_v30 = vmul.f32 %v1675_v24, %v3473_v15  ;;  %v2676_v39 = vpop.f32.mrb[42].mxu0 }
 0x73e   :  { %v1678_v41 = vpop.f32.mrb[43].mxu0  ;;  %v1709_v48 = vmul.f32 %v2676_v39, %v3513_v35 }
 0x73f   :  { %v1707_v38 = vmul.f32 %v1678_v41, %v3471_v14  ;;  %2689 = vmatprep.mubr.msk.f32.mxu1 %vm311_vm2, %v1706_v30 }
 0x741   :  { %2690 = vmatmul.mubr.msk.f32.vlgmr.msra.gmra.mrb[40].mxu1 %vm311_vm2, %v1707_v38 }
 0x742   :  { %2692 = vmatprep.mubr.msk.f32.mxu1 %vm311_vm2, %v1708_v40 }
 0x743   :  { %v2679_v33 = vpop.f32.mrb[44].mxu0 }
 0x744   :  { %v1691_v47 = vpop.f32.mrb[45].mxu0  ;;  %v1712_v36 = vmul.f32 %v2679_v33, %v3533_v16  ;;  %v2331_v16 = vld [vmem:[%s3743_s13 + $0x30] sm:$0xff] }
 0x745   :  { %v1710_v34 = vmul.f32 %v1691_v47, %v3519_v46  ;;  %v2680_v52 = vpop.f32.mrb[46].mxu0  ;;  %2693 = vmatmul.mubr.msk.f32.gmra.mrb[42].mxu1 %vm311_vm2, %v1709_v48  ;;  %v2329_v46 = vld [vmem:[%s3743_s13 + $0x20] sm:$0xff] }
 0x746   :  { %v1694_v15 = vpop.f32.mrb[47].mxu0  ;;  %v1713_v35 = vmul.f32 %v2680_v52, %v3530_v9  ;;  %v2805_v9 = vpack.c.bf16 %v2332_v42, %v2331_v16 }
 0x747   :  { %v1711_v14 = vmul.f32 %v1694_v15, %v3517_v43  ;;  %2695 = vmatprep.mubr.msk.f32.mxu1 %vm311_vm2, %v1710_v34  ;;  %v2330_v43 = vld [vmem:[%s3743_s13 + $0x28] sm:$0xff] }
 0x748   :  { %v2801_v37 = vpack.c.bf16 %v2330_v43, %v2329_v46  ;;  %v2334_v46 = vld [vmem:[%s3744_s14 + $0x1] ss:$0 sm:$0xff]  ;;  %s3030_s14 = smov [#allocation14]  }
 0x749   :  { %2696 = vmatmul.mubr.msk.f32.gmra.mrb[44].mxu1 %vm311_vm2, %v1711_v14  ;;  %s2185_s12 = sshll.u32 %s3030_s14, 4  ;;  %s2186_s12 = int_to_ptr.vmem [resolvable:$true] %s2185_s12 }
 0x74a   :  { %2698 = vmatprep.mubr.msk.f32.mxu1 %vm311_vm2, %v1712_v36  ;;  %2802 = vmatprep.subr.bf16.mxu1 %v2801_v37  ;;  %s2986_s21 = scalar_lea.vmem %s2186_s12, 1024  ;;  %p2991_p1 = scmp.lt.s32.totalorder %s2186_s12, %s2186_s12 }
 0x74b   :  { %2804 = vmatpush3.bf16.msra.mxu1 %v2801_v37  ;;  %p2987_p0 = scmp.ne.s32.totalorder %s2186_s12, %s2986_s21  ;;  %p2992_p2 = scmp.lt.s32.totalorder %s2986_s21, %s2986_s21 }
 0x74c   :  { %2806 = vmatprep.subr.bf16.mxu1 %v2805_v9 }
 0x74d   :  { %2699 = vmatmul.mubr.msk.f32.gmra.mrb[46].mxu1 %vm311_vm2, %v1713_v35  ;;  %p2993_p3 = por %p2992_p2, %p2991_p1 }
 0x74f   :  { %2808 = vmatpush3.bf16.msra.mxu1 %v2805_v9  ;;  %p2994_p4 = pnand %p2993_p3, %p2987_p0 }
 0x814   :  { %v2691_v53 = vpop.f32.mrb[40].mxu1 }
 0x815   :  { %v1823_v45 = vadd.f32 %v2691_v53, %v2307_v44  ;;  %v1817_v49 = vpop.f32.mrb[41].mxu1 }
 0x816   :  { %v1818_v50 = vadd.f32 %v2307_v44, %v1817_v49 }
 0x817   :  { %v1857_v2 = vmax.f32 %v1823_v45, 0.0 }
 0x818   :  { %v1856_v51 = vmax.f32 %v1818_v50, 0.0  ;;  %v2694_v1 = vpop.f32.mrb[42].mxu1 }
 0x819   :  { %v1833_v3 = vadd.f32 %v2694_v1, %v2307_v44  ;;  %v1827_v5 = vpop.f32.mrb[43].mxu1 }
 0x81a   :  { %v1828_v6 = vadd.f32 %v2307_v44, %v1827_v5  ;;  %2709 = vmatprep.mubr.msk.f32.mxu0 %vm311_vm2, %v1856_v51 }
 0x81b   :  { %2710 = vmatmul.mubr.msk.f32.vlgmr.msra.gmra.mrb[48].mxu0 %vm311_vm2, %v1857_v2  ;;  %v1859_v7 = vmax.f32 %v1833_v3, 0.0 }
 0x81c   :  { %v1858_v55 = vmax.f32 %v1828_v6, 0.0  ;;  %v2697_v8 = vpop.f32.mrb[44].mxu1 }
 0x81d   :  { %v1843_v17 = vadd.f32 %v2697_v8, %v2307_v44  ;;  %v1837_v11 = vpop.f32.mrb[45].mxu1 }
 0x81e   :  { %v1838_v56 = vadd.f32 %v2307_v44, %v1837_v11  ;;  %2712 = vmatprep.mubr.msk.f32.mxu0 %vm311_vm2, %v1858_v55 }
 0x81f   :  { %2713 = vmatmul.mubr.msk.f32.gmra.mrb[50].mxu0 %vm311_vm2, %v1859_v7  ;;  %v1861_v57 = vmax.f32 %v1843_v17, 0.0 }
 0x820   :  { %v1860_v12 = vmax.f32 %v1838_v56, 0.0  ;;  %v2700_v18 = vpop.f32.mrb[46].mxu1 }
 0x821   :  { %v1853_v22 = vadd.f32 %v2700_v18, %v2307_v44  ;;  %v1847_v20 = vpop.f32.mrb[47].mxu1 }
 0x822   :  { %v1848_v21 = vadd.f32 %v2307_v44, %v1847_v20  ;;  %2715 = vmatprep.mubr.msk.f32.mxu0 %vm311_vm2, %v1860_v12 }
 0x823   :  { %2716 = vmatmul.mubr.msk.f32.gmra.mrb[52].mxu0 %vm311_vm2, %v1861_v57  ;;  %v1863_v13 = vmax.f32 %v1853_v22, 0.0 }
 0x824   :  { %v1862_v27 = vmax.f32 %v1848_v21, 0.0 }
 0x826   :  { %2718 = vmatprep.mubr.msk.f32.mxu0 %vm311_vm2, %v1862_v27 }
 0x827   :  { %2719 = vmatmul.mubr.msk.f32.gmra.mrb[54].mxu0 %vm311_vm2, %v1863_v13 }
 0x8ee   :  { %v2711_v61 = vpop.f32.mrb[48].mxu0 }
 0x8ef   :  { %v1973_v28 = vadd.f32 %v2711_v61, %v2320_v23  ;;  %v1967_v10 = vpop.f32.mrb[49].mxu0 }
 0x8f0   :  { %v1968_v62 = vadd.f32 %v2320_v23, %v1967_v10 }
 0x8f1   :  { %v2007_v60 = vmax.f32 %v1973_v28, 0.0 }
 0x8f2   :  { %v2006_v58 = vmax.f32 %v1968_v62, 0.0  ;;  %v2714_v26 = vpop.f32.mrb[50].mxu0 }
 0x8f3   :  { %v1983_v31 = vadd.f32 %v2714_v26, %v2320_v23  ;;  %v1977_v32 = vpop.f32.mrb[51].mxu0 }
 0x8f4   :  { %v1978_v24 = vadd.f32 %v2320_v23, %v1977_v32  ;;  %2729 = vmatprep.mubr.msk.f32.mxu1 %vm311_vm2, %v2006_v58 }
 0x8f5   :  { %2730 = vmatmul.mubr.msk.f32.vlgmr.msra.gmra.mrb[48].mxu1 %vm311_vm2, %v2007_v60  ;;  %v2009_v41 = vmax.f32 %v1983_v31, 0.0 }
 0x8f6   :  { %v2008_v30 = vmax.f32 %v1978_v24, 0.0  ;;  %v2717_v39 = vpop.f32.mrb[52].mxu0 }
 0x8f7   :  { %v1993_v38 = vadd.f32 %v2717_v39, %v2320_v23  ;;  %v1987_v40 = vpop.f32.mrb[53].mxu0 }
 0x8f8   :  { %v1988_v48 = vadd.f32 %v2320_v23, %v1987_v40  ;;  %2732 = vmatprep.mubr.msk.f32.mxu1 %vm311_vm2, %v2008_v30 }
 0x8f9   :  { %2733 = vmatmul.mubr.msk.f32.gmra.mrb[50].mxu1 %vm311_vm2, %v2009_v41  ;;  %v2011_v34 = vmax.f32 %v1993_v38, 0.0 }
 0x8fa   :  { %v2010_v33 = vmax.f32 %v1988_v48, 0.0  ;;  %v2720_v47 = vpop.f32.mrb[54].mxu0 }
 0x8fb   :  { %v2003_v52 = vadd.f32 %v2720_v47, %v2320_v23  ;;  %v1997_v15 = vpop.f32.mrb[55].mxu0 }
 0x8fc   :  { %v1998_v14 = vadd.f32 %v2320_v23, %v1997_v15  ;;  %2735 = vmatprep.mubr.msk.f32.mxu1 %vm311_vm2, %v2010_v33 }
 0x8fd   :  { %2736 = vmatmul.mubr.msk.f32.gmra.mrb[52].mxu1 %vm311_vm2, %v2011_v34  ;;  %v2013_v35 = vmax.f32 %v2003_v52, 0.0 }
 0x8fe   :  { %v2012_v36 = vmax.f32 %v1998_v14, 0.0 }
 0x900   :  { %2738 = vmatprep.mubr.msk.f32.mxu1 %vm311_vm2, %v2012_v36 }
 0x901   :  { %2739 = vmatmul.mubr.msk.f32.gmra.mrb[54].mxu1 %vm311_vm2, %v2013_v35 }
 0x9c8   :  { %v2731_v43 = vpop.f32.mrb[48].mxu1 }
 0x9c9   :  { %v2123_v16 = vadd.f32 %v2731_v43, %v2334_v46  ;;  %v2117_v37 = vpop.f32.mrb[49].mxu1 }
 0x9ca   :  { %v2118_v42 = vadd.f32 %v2334_v46, %v2117_v37 }
 0x9cb   :  { %v2157_v9 = vmax.f32 %v2123_v16, 0.0 }
 0x9cc   :  { %v2156_v44 = vmax.f32 %v2118_v42, 0.0  ;;  %v2734_v53 = vpop.f32.mrb[50].mxu1 }
 0x9cd   :  { %v2165_v45 = vadd.f32 %v2157_v9, %v3614_v4  ;;  %v2133_v49 = vadd.f32 %v2734_v53, %v2334_v46  ;;  %v2127_v50 = vpop.f32.mrb[51].mxu1 }
 0x9ce   :  { %v2164_v51 = vadd.f32 %v2156_v44, %v3616_v54  ;;  %v2128_v1 = vadd.f32 %v2334_v46, %v2127_v50 }
 0x9cf   :  { %2173 = vst [vmem:[#allocation14 + $0x8] sm:$0xff] %v2165_v45  ;;  %v2159_v2 = vmax.f32 %v2133_v49, 0.0 }
 0x9d0   :  { %2172 = vst [vmem:[#allocation14] sm:$0xff] %v2164_v51  ;;  %v2158_v3 = vmax.f32 %v2128_v1, 0.0  ;;  %v2737_v5 = vpop.f32.mrb[52].mxu1 }
 0x9d1   :  { %v2167_v6 = vadd.f32 %v2159_v2, %v3620_v19  ;;  %v2143_v55 = vadd.f32 %v2737_v5, %v2334_v46  ;;  %v2137_v8 = vpop.f32.mrb[53].mxu1 }
 0x9d2   :  { %v2166_v7 = vadd.f32 %v2158_v3, %v3622_v25  ;;  %v2138_v17 = vadd.f32 %v2334_v46, %v2137_v8 }
 0x9d3   :  { %2175 = vst [vmem:[#allocation14 + $0x18] sm:$0xff] %v2167_v6  ;;  %v2161_v11 = vmax.f32 %v2143_v55, 0.0 }
 0x9d4   :  { %2174 = vst [vmem:[#allocation14 + $0x10] sm:$0xff] %v2166_v7  ;;  %v2160_v4 = vmax.f32 %v2138_v17, 0.0  ;;  %v2740_v56 = vpop.f32.mrb[54].mxu1 }
 0x9d5   :  { %v2169_v54 = vadd.f32 %v2161_v11, %v3626_v29  ;;  %v2153_v12 = vadd.f32 %v2740_v56, %v2334_v46  ;;  %v2147_v18 = vpop.f32.mrb[55].mxu1 }
 0x9d6   :  { %v2168_v57 = vadd.f32 %v2160_v4, %v3628_v59  ;;  %v2148_v22 = vadd.f32 %v2334_v46, %v2147_v18 }
 0x9d7   :  { %2177 = vst [vmem:[#allocation14 + $0x28] sm:$0xff] %v2169_v54  ;;  %v2163_v20 = vmax.f32 %v2153_v12, 0.0 }
 0x9d8   :  { %2176 = vst [vmem:[#allocation14 + $0x20] sm:$0xff] %v2168_v57  ;;  %v2162_v19 = vmax.f32 %v2148_v22, 0.0 }
 0x9d9   :  { %v2171_v25 = vadd.f32 %v2163_v20, %v3630_v63 }
 0x9da   :  { %v2170_v21 = vadd.f32 %v2162_v19, %v3632_v0 }
 0x9db   :  { %2179 = vst [vmem:[#allocation14 + $0x38] sm:$0xff] %v2171_v25 }
 0x9dc   :  { %2178 = vst [vmem:[#allocation14 + $0x30] sm:$0xff] %v2170_v21 }
 0x9dd   :  { %2997 = shalt.err (!%p2994_p4)
}
 0x9de   :  { %s2998_s28 = scalar_lea.hbm %s3745_s15, 1024 }
 0x9df   :  { %p2999_p5 = scmp.ne.s32.totalorder %s3745_s15, %s2998_s28  ;;  %p3002_p6 = scmp.lt.u32.totalorder %s2998_s28, %s3745_s15 }
 0x9e1   :  { %p3004_p7 = pnand %p3002_p6, %p2999_p5 }
 0x9e3   :  { %3007 = shalt.err (!%p3004_p7)
}
 0x9e4   :  { %2191 = dma.vmem_to_hbm [thread:$0]  %s2186_s12, 1024, %s3745_s15, [#allocation4], %s3020_s30, %s3020_s30, %s3021_s16  }
 0x9e5   :  { %3016 = dma.done.wait [#allocation4], 1024  }
 0x9e6   :  { %3017 = vsyncadd [#allocation4], 4294966272 }
 0x9e7   :  { %2195 = vsyncpa [#allocation3], 1 }
 0x9e8   :  { %2196 = vsyncpa [#allocation6], 1 }
 0x9e9   :  { %2197 = vsyncpa [#allocation9], 1 }
 0x9ea   :  { %2198 = vsyncpa [#allocation12], 1 }
 0x9eb   :  { %2199 = vsyncpa [#allocation4], 1 }

</bundles_post_ra>
